<compile_context>
chip_gen: v6e
topology: v6e:2x2x1
jax: 0.10.0
libtpu: 0.0.40
codegen_flags: <defaults>
</compile_context>

<pallas_src>
import functools

import jax
import jax.numpy as jnp
from jax.experimental import pallas as pl
from jax.experimental.pallas import tpu as pltpu


# ------------------------------ fused kernel --------------------------------

def _decoder_layer_kernel(
    tgt_ref, mem_ref, qpos_ref, pos_ref,
    sa_w_ref, sa_b_ref, sa_ow_ref, sa_ob_ref,
    ca_w_ref, ca_b_ref, ca_ow_ref, ca_ob_ref,
    w1_ref, b1_ref, w2_ref, b2_ref,
    ln1w_ref, ln1b_ref, ln2w_ref, ln2b_ref, ln3w_ref, ln3b_ref,
    out_ref,
    heads_ref,                       # VMEM scratch (L, E) f32: concat'd heads
    *, H, Dh,
):
    E = H * Dh
    scale = 1.0 / (Dh ** 0.5)

    def mm(x, w):
        # bf16 operands at the MXU boundary, f32 accumulation (w already bf16).
        return jnp.dot(x.astype(jnp.bfloat16), w,
                       preferred_element_type=jnp.float32)

    def layer_norm(x, g, b):
        mu = jnp.mean(x, axis=-1, keepdims=True)
        var = jnp.mean(jnp.square(x - mu), axis=-1, keepdims=True)
        return (x - mu) * jax.lax.rsqrt(var + 1e-5) * g + b

    def attention(q, k, v, out_w, out_b):
        # q: (L, E); k, v: (T, E); out_w: (E, E) bf16; out_b: (1, E) f32.
        for h in range(H):                       # static unrolled head loop
            sl = slice(h * Dh, (h + 1) * Dh)
            s = jnp.dot((q[:, sl] * scale).astype(jnp.bfloat16),
                        k[:, sl].T.astype(jnp.bfloat16),
                        preferred_element_type=jnp.float32)       # (L, T)
            m = jnp.max(s, axis=-1, keepdims=True)
            p = jnp.exp(s - m)
            p = p * pl.reciprocal(jnp.sum(p, axis=-1, keepdims=True),
                                  approx=True)
            heads_ref[:, sl] = jnp.dot(p.astype(jnp.bfloat16),
                                       v[:, sl].astype(jnp.bfloat16),
                                       preferred_element_type=jnp.float32)
        # One out-projection matmul over the concatenated heads (contraction
        # depth E instead of Dh per head).
        return mm(heads_ref[...], out_w) + out_b

    tgt = tgt_ref[...]       # (L, E) f32   (this batch element)
    mem = mem_ref[...]       # (S, E) f32
    qpos = qpos_ref[...]     # (L, E) f32
    pos = pos_ref[...]       # (S, E) f32

    sa_w = sa_w_ref[...]     # (E, 3E) bf16
    sa_b = sa_b_ref[...]     # (1, 3E) f32
    ca_w = ca_w_ref[...]     # (E, 3E) bf16
    ca_b = ca_b_ref[...]     # (1, 3E) f32

    # ----------------------------- self attention ----------------------------
    qk_src = tgt + qpos
    qk = mm(qk_src, sa_w[:, :2 * E]) + sa_b[:, :2 * E]   # fused Q,K projection
    v = mm(tgt, sa_w[:, 2 * E:]) + sa_b[:, 2 * E:]
    t2 = attention(qk[:, :E], qk[:, E:], v, sa_ow_ref[...], sa_ob_ref[...])
    x = layer_norm(tgt + t2, ln1w_ref[...], ln1b_ref[...])

    # ----------------------------- cross attention ---------------------------
    q = mm(x + qpos, ca_w[:, :E]) + ca_b[:, :E]
    k = mm(mem + pos, ca_w[:, E:2 * E]) + ca_b[:, E:2 * E]
    v = mm(mem, ca_w[:, 2 * E:]) + ca_b[:, 2 * E:]
    t2 = attention(q, k, v, ca_ow_ref[...], ca_ob_ref[...])
    x = layer_norm(x + t2, ln2w_ref[...], ln2b_ref[...])

    # ------------------------------- feed-forward ----------------------------
    hid = jnp.maximum(mm(x, w1_ref[...]) + b1_ref[...], 0.0)   # relu
    t2 = mm(hid, w2_ref[...]) + b2_ref[...]
    out_ref[...] = layer_norm(x + t2, ln3w_ref[...], ln3b_ref[...])


# ------------------------------ python wrapper -------------------------------

def transformer_decoder_layer_forward(tgt, memory, params, nhead,
                                      pos=None, query_pos=None):
    """forward_post semantics (normalize_before=False). Dropout = identity."""
    L, N, E = tgt.shape
    S = memory.shape[0]
    Dh = E // nhead
    F = params["linear1_w"].shape[1]
    f32, bf16 = jnp.float32, jnp.bfloat16

    if query_pos is None:
        query_pos = jnp.zeros_like(tgt)
    if pos is None:
        pos = jnp.zeros_like(memory)

    def prep_mha(p):
        return (
            p["in_proj_weight"].T.astype(bf16),            # (E, 3E)
            p["in_proj_bias"].reshape(1, 3 * E).astype(f32),
            p["out_proj_weight"].T.astype(bf16),           # (E, E)
            p["out_proj_bias"].reshape(1, E).astype(f32),
        )

    # Batch-major layout so the grid iterates over the batch dimension.
    args = (
        jnp.transpose(tgt, (1, 0, 2)).astype(f32),         # (N, L, E)
        jnp.transpose(memory, (1, 0, 2)).astype(f32),      # (N, S, E)
        jnp.transpose(query_pos, (1, 0, 2)).astype(f32),   # (N, L, E)
        jnp.transpose(pos, (1, 0, 2)).astype(f32),         # (N, S, E)
        *prep_mha(params["self_attn"]),
        *prep_mha(params["cross_attn"]),
        params["linear1_w"].astype(bf16),
        params["linear1_b"].reshape(1, F).astype(f32),
        params["linear2_w"].astype(bf16),
        params["linear2_b"].reshape(1, E).astype(f32),
        params["norm1_w"].reshape(1, E).astype(f32),
        params["norm1_b"].reshape(1, E).astype(f32),
        params["norm2_w"].reshape(1, E).astype(f32),
        params["norm2_b"].reshape(1, E).astype(f32),
        params["norm3_w"].reshape(1, E).astype(f32),
        params["norm3_b"].reshape(1, E).astype(f32),
    )

    def batch_spec(T):
        # One batch element per grid step; leading dim squeezed away.
        return pl.BlockSpec((None, T, E), lambda n: (n, 0, 0))

    def const_spec(shape):
        # Same block for every grid step -> stays VMEM-resident.
        nd = len(shape)
        return pl.BlockSpec(shape, lambda n, _nd=nd: (0,) * _nd)

    in_specs = [batch_spec(L), batch_spec(S), batch_spec(L), batch_spec(S)]
    in_specs += [const_spec(a.shape) for a in args[4:]]

    kernel = functools.partial(_decoder_layer_kernel, H=nhead, Dh=Dh)
    out_nle = pl.pallas_call(
        kernel,
        out_shape=jax.ShapeDtypeStruct((N, L, E), f32),
        grid=(N,),
        in_specs=in_specs,
        out_specs=pl.BlockSpec((None, L, E), lambda n: (n, 0, 0)),
        scratch_shapes=[pltpu.VMEM((L, E), jnp.float32)],
        compiler_params=pltpu.CompilerParams(
            dimension_semantics=("parallel",)),
    )(*args)
    return jnp.transpose(out_nle, (1, 0, 2))                # back to (L, N, E)


# -------------------------- pure-JAX reference (f32) -------------------------

def _reference_forward(tgt, memory, params, nhead, pos, query_pos):
    L, N, E = tgt.shape
    S = memory.shape[0]
    Dh = E // nhead
    scale = 1.0 / (Dh ** 0.5)

    def mha(q_in, k_in, v_in, p):
        Lq, Sk = q_in.shape[0], k_in.shape[0]
        w, b = p["in_proj_weight"], p["in_proj_bias"]
        q = q_in.reshape(Lq * N, E) @ w[:E].T + b[:E]
        k = k_in.reshape(Sk * N, E) @ w[E:2 * E].T + b[E:2 * E]
        v = v_in.reshape(Sk * N, E) @ w[2 * E:].T + b[2 * E:]
        q = q.reshape(Lq, N * nhead, Dh).transpose(1, 0, 2) * scale
        k = k.reshape(Sk, N * nhead, Dh).transpose(1, 0, 2)
        v = v.reshape(Sk, N * nhead, Dh).transpose(1, 0, 2)
        s = jnp.einsum("bqd,bkd->bqk", q, k)
        a = jax.nn.softmax(s, axis=-1)
        o = jnp.einsum("bqk,bkd->bqd", a, v)
        o = o.transpose(1, 0, 2).reshape(Lq * N, E)
        o = o @ p["out_proj_weight"].T + p["out_proj_bias"]
        return o.reshape(Lq, N, E)

    def ln(x, g, b):
        mu = x.mean(-1, keepdims=True)
        var = ((x - mu) ** 2).mean(-1, keepdims=True)
        return (x - mu) / jnp.sqrt(var + 1e-5) * g + b

    q = k = tgt + query_pos
    t2 = mha(q, k, tgt, params["self_attn"])
    x = ln(tgt + t2, params["norm1_w"], params["norm1_b"])
    t2 = mha(x + query_pos, memory + pos, memory, params["cross_attn"])
    x = ln(x + t2, params["norm2_w"], params["norm2_b"])
    h = jax.nn.relu(x.reshape(L * N, E) @ params["linear1_w"] + params["linear1_b"])
    t2 = (h @ params["linear2_w"] + params["linear2_b"]).reshape(L, N, E)
    return ln(x + t2, params["norm3_w"], params["norm3_b"])


# ------------------------------- param init ----------------------------------

def init_params(key, d_model, nhead, dim_feedforward):
    ks = jax.random.split(key, 18)
    s = 0.05

    def mha_params(k1, k2, k3, k4):
        return {
            "in_proj_weight": s * jax.random.normal(k1, (3 * d_model, d_model), jnp.float32),
            "in_proj_bias": s * jax.random.normal(k2, (3 * d_model,), jnp.float32),
            "out_proj_weight": s * jax.random.normal(k3, (d_model, d_model), jnp.float32),
            "out_proj_bias": s * jax.random.normal(k4, (d_model,), jnp.float32),
        }

    return {
        "self_attn": mha_params(*ks[0:4]),
        "cross_attn": mha_params(*ks[4:8]),
        # stored as (in, out), i.e. already transposed relative to torch Linear
        "linear1_w": s * jax.random.normal(ks[8], (d_model, dim_feedforward), jnp.float32),
        "linear1_b": s * jax.random.normal(ks[9], (dim_feedforward,), jnp.float32),
        "linear2_w": s * jax.random.normal(ks[10], (dim_feedforward, d_model), jnp.float32),
        "linear2_b": s * jax.random.normal(ks[11], (d_model,), jnp.float32),
        "norm1_w": 1.0 + 0.1 * jax.random.normal(ks[12], (d_model,), jnp.float32),
        "norm1_b": 0.1 * jax.random.normal(ks[13], (d_model,), jnp.float32),
        "norm2_w": 1.0 + 0.1 * jax.random.normal(ks[14], (d_model,), jnp.float32),
        "norm2_b": 0.1 * jax.random.normal(ks[15], (d_model,), jnp.float32),
        "norm3_w": 1.0 + 0.1 * jax.random.normal(ks[16], (d_model,), jnp.float32),
        "norm3_b": 0.1 * jax.random.normal(ks[17], (d_model,), jnp.float32),
    }


# ---------------------------------- main --------------------------------------

if __name__ == "__main__":
    d_model = 32
    nhead = 4
    dim_feedforward = 64
    L = 8    # tgt (query) sequence length
    S = 12   # memory sequence length
    N = 2    # batch

    root = jax.random.PRNGKey(0)
    k_p, k_tgt, k_mem, k_pos, k_qpos = jax.random.split(root, 5)

    params = init_params(k_p, d_model, nhead, dim_feedforward)
    tgt = jax.random.normal(k_tgt, (L, N, d_model), jnp.float32)
    memory = jax.random.normal(k_mem, (S, N, d_model), jnp.float32)
    pos = jax.random.normal(k_pos, (S, N, d_model), jnp.float32)
    query_pos = jax.random.normal(k_qpos, (L, N, d_model), jnp.float32)

    fwd = jax.jit(functools.partial(transformer_decoder_layer_forward, nhead=nhead))
    out = fwd(tgt, memory, params, pos=pos, query_pos=query_pos)
    out = jax.block_until_ready(out)

    ref = jax.block_until_ready(
        _reference_forward(tgt, memory, params, nhead, pos, query_pos))

    assert out.shape == (L, N, d_model)
    assert jnp.all(jnp.isfinite(out))
    # Loose tolerance: kernel uses bf16 MXU inputs + approx reciprocal softmax.
    assert jnp.allclose(out, ref, atol=1e-1, rtol=1e-1), \
        float(jnp.max(jnp.abs(out - ref)))
    print("KERNEL_OK")
</pallas_src>

<mosaic_0001>
module attributes {stable_mosaic.version = 11 : i64} {
  func.func @_decoder_layer_kernel(%arg0: i32, %arg1: memref<1x8x32xf32, #tpu.memory_space<vmem>>, %arg2: memref<1x12x32xf32, #tpu.memory_space<vmem>>, %arg3: memref<1x8x32xf32, #tpu.memory_space<vmem>>, %arg4: memref<1x12x32xf32, #tpu.memory_space<vmem>>, %arg5: memref<32x96xbf16, #tpu.memory_space<vmem>>, %arg6: memref<1x96xf32, #tpu.memory_space<vmem>>, %arg7: memref<32x32xbf16, #tpu.memory_space<vmem>>, %arg8: memref<1x32xf32, #tpu.memory_space<vmem>>, %arg9: memref<32x96xbf16, #tpu.memory_space<vmem>>, %arg10: memref<1x96xf32, #tpu.memory_space<vmem>>, %arg11: memref<32x32xbf16, #tpu.memory_space<vmem>>, %arg12: memref<1x32xf32, #tpu.memory_space<vmem>>, %arg13: memref<32x64xbf16, #tpu.memory_space<vmem>>, %arg14: memref<1x64xf32, #tpu.memory_space<vmem>>, %arg15: memref<64x32xbf16, #tpu.memory_space<vmem>>, %arg16: memref<1x32xf32, #tpu.memory_space<vmem>>, %arg17: memref<1x32xf32, #tpu.memory_space<vmem>>, %arg18: memref<1x32xf32, #tpu.memory_space<vmem>>, %arg19: memref<1x32xf32, #tpu.memory_space<vmem>>, %arg20: memref<1x32xf32, #tpu.memory_space<vmem>>, %arg21: memref<1x32xf32, #tpu.memory_space<vmem>>, %arg22: memref<1x32xf32, #tpu.memory_space<vmem>>, %arg23: memref<1x8x32xf32, #tpu.memory_space<vmem>>, %arg24: memref<8x32xf32, #tpu.memory_space<vmem>>) attributes {dimension_semantics = [#tpu.dimension_semantics<parallel>], iteration_bounds = array<i64: 2>, scalar_prefetch = 0 : i64, scratch_operands = 1 : i64, tpu.core_type = #tpu.core_type<tc>, window_params = [{transform_indices = @transform_0, window_bounds = array<i64: 1, 8, 32>}, {transform_indices = @transform_1, window_bounds = array<i64: 1, 12, 32>}, {transform_indices = @transform_2, window_bounds = array<i64: 1, 8, 32>}, {transform_indices = @transform_3, window_bounds = array<i64: 1, 12, 32>}, {pipeline_mode = #tpu.pipeline_mode<synchronous>, transform_indices = @transform_4, window_bounds = array<i64: 32, 96>}, {pipeline_mode = #tpu.pipeline_mode<synchronous>, transform_indices = @transform_5, window_bounds = array<i64: 1, 96>}, {pipeline_mode = #tpu.pipeline_mode<synchronous>, transform_indices = @transform_6, window_bounds = array<i64: 32, 32>}, {pipeline_mode = #tpu.pipeline_mode<synchronous>, transform_indices = @transform_7, window_bounds = array<i64: 1, 32>}, {pipeline_mode = #tpu.pipeline_mode<synchronous>, transform_indices = @transform_8, window_bounds = array<i64: 32, 96>}, {pipeline_mode = #tpu.pipeline_mode<synchronous>, transform_indices = @transform_9, window_bounds = array<i64: 1, 96>}, {pipeline_mode = #tpu.pipeline_mode<synchronous>, transform_indices = @transform_10, window_bounds = array<i64: 32, 32>}, {pipeline_mode = #tpu.pipeline_mode<synchronous>, transform_indices = @transform_11, window_bounds = array<i64: 1, 32>}, {pipeline_mode = #tpu.pipeline_mode<synchronous>, transform_indices = @transform_12, window_bounds = array<i64: 32, 64>}, {pipeline_mode = #tpu.pipeline_mode<synchronous>, transform_indices = @transform_13, window_bounds = array<i64: 1, 64>}, {pipeline_mode = #tpu.pipeline_mode<synchronous>, transform_indices = @transform_14, window_bounds = array<i64: 64, 32>}, {pipeline_mode = #tpu.pipeline_mode<synchronous>, transform_indices = @transform_15, window_bounds = array<i64: 1, 32>}, {pipeline_mode = #tpu.pipeline_mode<synchronous>, transform_indices = @transform_16, window_bounds = array<i64: 1, 32>}, {pipeline_mode = #tpu.pipeline_mode<synchronous>, transform_indices = @transform_17, window_bounds = array<i64: 1, 32>}, {pipeline_mode = #tpu.pipeline_mode<synchronous>, transform_indices = @transform_18, window_bounds = array<i64: 1, 32>}, {pipeline_mode = #tpu.pipeline_mode<synchronous>, transform_indices = @transform_19, window_bounds = array<i64: 1, 32>}, {pipeline_mode = #tpu.pipeline_mode<synchronous>, transform_indices = @transform_20, window_bounds = array<i64: 1, 32>}, {pipeline_mode = #tpu.pipeline_mode<synchronous>, transform_indices = @transform_21, window_bounds = array<i64: 1, 32>}, {transform_indices = @transform_22, window_bounds = array<i64: 1, 8, 32>}]} {
    %c0 = arith.constant 0 : index
    %c0_0 = arith.constant 0 : index
    %c0_1 = arith.constant 0 : index
    %0 = vector.load %arg1[%c0, %c0_0, %c0_1] : memref<1x8x32xf32, #tpu.memory_space<vmem>>, vector<1x8x32xf32>
    %1 = vector.shape_cast %0 : vector<1x8x32xf32> to vector<8x32xf32>
    %c0_2 = arith.constant 0 : index
    %c0_3 = arith.constant 0 : index
    %c0_4 = arith.constant 0 : index
    %2 = vector.load %arg2[%c0_2, %c0_3, %c0_4] : memref<1x12x32xf32, #tpu.memory_space<vmem>>, vector<1x12x32xf32>
    %3 = vector.shape_cast %2 : vector<1x12x32xf32> to vector<12x32xf32>
    %c0_5 = arith.constant 0 : index
    %c0_6 = arith.constant 0 : index
    %c0_7 = arith.constant 0 : index
    %4 = vector.load %arg3[%c0_5, %c0_6, %c0_7] : memref<1x8x32xf32, #tpu.memory_space<vmem>>, vector<1x8x32xf32>
    %5 = vector.shape_cast %4 : vector<1x8x32xf32> to vector<8x32xf32>
    %c0_8 = arith.constant 0 : index
    %c0_9 = arith.constant 0 : index
    %c0_10 = arith.constant 0 : index
    %6 = vector.load %arg4[%c0_8, %c0_9, %c0_10] : memref<1x12x32xf32, #tpu.memory_space<vmem>>, vector<1x12x32xf32>
    %7 = vector.shape_cast %6 : vector<1x12x32xf32> to vector<12x32xf32>
    %c0_11 = arith.constant 0 : index
    %c0_12 = arith.constant 0 : index
    %8 = vector.load %arg5[%c0_11, %c0_12] : memref<32x96xbf16, #tpu.memory_space<vmem>>, vector<32x96xbf16>
    %c0_13 = arith.constant 0 : index
    %c0_14 = arith.constant 0 : index
    %9 = vector.load %arg6[%c0_13, %c0_14] : memref<1x96xf32, #tpu.memory_space<vmem>>, vector<1x96xf32>
    %c0_15 = arith.constant 0 : index
    %c0_16 = arith.constant 0 : index
    %10 = vector.load %arg9[%c0_15, %c0_16] : memref<32x96xbf16, #tpu.memory_space<vmem>>, vector<32x96xbf16>
    %c0_17 = arith.constant 0 : index
    %c0_18 = arith.constant 0 : index
    %11 = vector.load %arg10[%c0_17, %c0_18] : memref<1x96xf32, #tpu.memory_space<vmem>>, vector<1x96xf32>
    %12 = arith.addf %1, %5 : vector<8x32xf32>
    %13 = vector.extract_strided_slice %8 {offsets = [0, 0], sizes = [32, 64], strides = [1, 1]} : vector<32x96xbf16> to vector<32x64xbf16>
    %14 = arith.truncf %12 : vector<8x32xf32> to vector<8x32xbf16>
    %cst = arith.constant dense<0.000000e+00> : vector<8x64xf32>
    %15 = tpu.matmul %14, %13, %cst {dimension_numbers = #tpu.dot_dimension_numbers<[1], [0], [0], [1], [0, 0, 1, 1], [], []>} : vector<8x32xbf16>, vector<32x64xbf16>, vector<8x64xf32> -> vector<8x64xf32>
    %16 = vector.extract_strided_slice %9 {offsets = [0, 0], sizes = [1, 64], strides = [1, 1]} : vector<1x96xf32> to vector<1x64xf32>
    %17 = vector.broadcast %16 : vector<1x64xf32> to vector<8x64xf32>
    %18 = arith.addf %15, %17 : vector<8x64xf32>
    %19 = vector.extract_strided_slice %8 {offsets = [0, 64], sizes = [32, 32], strides = [1, 1]} : vector<32x96xbf16> to vector<32x32xbf16>
    %20 = arith.truncf %1 : vector<8x32xf32> to vector<8x32xbf16>
    %cst_19 = arith.constant dense<0.000000e+00> : vector<8x32xf32>
    %21 = tpu.matmul %20, %19, %cst_19 {dimension_numbers = #tpu.dot_dimension_numbers<[1], [0], [0], [1], [0, 0, 1, 1], [], []>} : vector<8x32xbf16>, vector<32x32xbf16>, vector<8x32xf32> -> vector<8x32xf32>
    %22 = vector.extract_strided_slice %9 {offsets = [0, 64], sizes = [1, 32], strides = [1, 1]} : vector<1x96xf32> to vector<1x32xf32>
    %23 = vector.broadcast %22 : vector<1x32xf32> to vector<8x32xf32>
    %24 = arith.addf %21, %23 : vector<8x32xf32>
    %25 = vector.extract_strided_slice %18 {offsets = [0, 0], sizes = [8, 32], strides = [1, 1]} : vector<8x64xf32> to vector<8x32xf32>
    %26 = vector.extract_strided_slice %18 {offsets = [0, 32], sizes = [8, 32], strides = [1, 1]} : vector<8x64xf32> to vector<8x32xf32>
    %c0_20 = arith.constant 0 : index
    %c0_21 = arith.constant 0 : index
    %27 = vector.load %arg7[%c0_20, %c0_21] : memref<32x32xbf16, #tpu.memory_space<vmem>>, vector<32x32xbf16>
    %c0_22 = arith.constant 0 : index
    %c0_23 = arith.constant 0 : index
    %28 = vector.load %arg8[%c0_22, %c0_23] : memref<1x32xf32, #tpu.memory_space<vmem>>, vector<1x32xf32>
    %29 = vector.extract_strided_slice %25 {offsets = [0, 0], sizes = [8, 8], strides = [1, 1]} : vector<8x32xf32> to vector<8x8xf32>
    %cst_24 = arith.constant 0.353553385 : f32
    %30 = vector.broadcast %cst_24 : f32 to vector<8x8xf32>
    %31 = arith.mulf %29, %30 : vector<8x8xf32>
    %32 = arith.truncf %31 : vector<8x8xf32> to vector<8x8xbf16>
    %33 = vector.extract_strided_slice %26 {offsets = [0, 0], sizes = [8, 8], strides = [1, 1]} : vector<8x32xf32> to vector<8x8xf32>
    %34 = tpu.transpose %33, [1, 0] : vector<8x8xf32> -> vector<8x8xf32>
    %35 = arith.truncf %34 : vector<8x8xf32> to vector<8x8xbf16>
    %cst_25 = arith.constant dense<0.000000e+00> : vector<8x8xf32>
    %36 = tpu.matmul %32, %35, %cst_25 {dimension_numbers = #tpu.dot_dimension_numbers<[1], [0], [0], [1], [0, 0, 1, 1], [], []>} : vector<8x8xbf16>, vector<8x8xbf16>, vector<8x8xf32> -> vector<8x8xf32>
    %cst_26 = arith.constant dense<0xFF800000> : vector<8xf32>
    %37 = vector.multi_reduction <maximumf>, %36, %cst_26 [1] : vector<8x8xf32> to vector<8xf32>
    %38 = vector.shape_cast %37 : vector<8xf32> to vector<8x1xf32>
    %39 = vector.broadcast %38 : vector<8x1xf32> to vector<8x8xf32>
    %40 = arith.subf %36, %39 : vector<8x8xf32>
    %41 = math.exp %40 : vector<8x8xf32>
    %cst_27 = arith.constant dense<0.000000e+00> : vector<8xf32>
    %42 = vector.multi_reduction <add>, %41, %cst_27 [1] : vector<8x8xf32> to vector<8xf32>
    %43 = vector.shape_cast %42 : vector<8xf32> to vector<8x1xf32>
    %44 = tpu.reciprocal %43 {approx = true} : vector<8x1xf32> -> vector<8x1xf32>
    %45 = vector.broadcast %44 : vector<8x1xf32> to vector<8x8xf32>
    %46 = arith.mulf %41, %45 : vector<8x8xf32>
    %47 = arith.truncf %46 : vector<8x8xf32> to vector<8x8xbf16>
    %48 = vector.extract_strided_slice %24 {offsets = [0, 0], sizes = [8, 8], strides = [1, 1]} : vector<8x32xf32> to vector<8x8xf32>
    %49 = arith.truncf %48 : vector<8x8xf32> to vector<8x8xbf16>
    %cst_28 = arith.constant dense<0.000000e+00> : vector<8x8xf32>
    %50 = tpu.matmul %47, %49, %cst_28 {dimension_numbers = #tpu.dot_dimension_numbers<[1], [0], [0], [1], [0, 0, 1, 1], [], []>} : vector<8x8xbf16>, vector<8x8xbf16>, vector<8x8xf32> -> vector<8x8xf32>
    %c0_29 = arith.constant 0 : index
    %c0_30 = arith.constant 0 : index
    %51 = vector.load %arg24[%c0_29, %c0_30] : memref<8x32xf32, #tpu.memory_space<vmem>>, vector<8x8xf32>
    tpu.vector_store %arg24[%c0_29, %c0_30], %50 {strides = array<i32>} : memref<8x32xf32, #tpu.memory_space<vmem>>, vector<8x8xf32>,
    %52 = vector.extract_strided_slice %25 {offsets = [0, 8], sizes = [8, 8], strides = [1, 1]} : vector<8x32xf32> to vector<8x8xf32>
    %cst_31 = arith.constant 0.353553385 : f32
    %53 = vector.broadcast %cst_31 : f32 to vector<8x8xf32>
    %54 = arith.mulf %52, %53 : vector<8x8xf32>
    %55 = arith.truncf %54 : vector<8x8xf32> to vector<8x8xbf16>
    %56 = vector.extract_strided_slice %26 {offsets = [0, 8], sizes = [8, 8], strides = [1, 1]} : vector<8x32xf32> to vector<8x8xf32>
    %57 = tpu.transpose %56, [1, 0] : vector<8x8xf32> -> vector<8x8xf32>
    %58 = arith.truncf %57 : vector<8x8xf32> to vector<8x8xbf16>
    %cst_32 = arith.constant dense<0.000000e+00> : vector<8x8xf32>
    %59 = tpu.matmul %55, %58, %cst_32 {dimension_numbers = #tpu.dot_dimension_numbers<[1], [0], [0], [1], [0, 0, 1, 1], [], []>} : vector<8x8xbf16>, vector<8x8xbf16>, vector<8x8xf32> -> vector<8x8xf32>
    %cst_33 = arith.constant dense<0xFF800000> : vector<8xf32>
    %60 = vector.multi_reduction <maximumf>, %59, %cst_33 [1] : vector<8x8xf32> to vector<8xf32>
    %61 = vector.shape_cast %60 : vector<8xf32> to vector<8x1xf32>
    %62 = vector.broadcast %61 : vector<8x1xf32> to vector<8x8xf32>
    %63 = arith.subf %59, %62 : vector<8x8xf32>
    %64 = math.exp %63 : vector<8x8xf32>
    %cst_34 = arith.constant dense<0.000000e+00> : vector<8xf32>
    %65 = vector.multi_reduction <add>, %64, %cst_34 [1] : vector<8x8xf32> to vector<8xf32>
    %66 = vector.shape_cast %65 : vector<8xf32> to vector<8x1xf32>
    %67 = tpu.reciprocal %66 {approx = true} : vector<8x1xf32> -> vector<8x1xf32>
    %68 = vector.broadcast %67 : vector<8x1xf32> to vector<8x8xf32>
    %69 = arith.mulf %64, %68 : vector<8x8xf32>
    %70 = arith.truncf %69 : vector<8x8xf32> to vector<8x8xbf16>
    %71 = vector.extract_strided_slice %24 {offsets = [0, 8], sizes = [8, 8], strides = [1, 1]} : vector<8x32xf32> to vector<8x8xf32>
    %72 = arith.truncf %71 : vector<8x8xf32> to vector<8x8xbf16>
    %cst_35 = arith.constant dense<0.000000e+00> : vector<8x8xf32>
    %73 = tpu.matmul %70, %72, %cst_35 {dimension_numbers = #tpu.dot_dimension_numbers<[1], [0], [0], [1], [0, 0, 1, 1], [], []>} : vector<8x8xbf16>, vector<8x8xbf16>, vector<8x8xf32> -> vector<8x8xf32>
    %c0_36 = arith.constant 0 : index
    %c8 = arith.constant 8 : index
    %74 = vector.load %arg24[%c0_36, %c8] : memref<8x32xf32, #tpu.memory_space<vmem>>, vector<8x8xf32>
    tpu.vector_store %arg24[%c0_36, %c8], %73 {strides = array<i32>} : memref<8x32xf32, #tpu.memory_space<vmem>>, vector<8x8xf32>,
    %75 = vector.extract_strided_slice %25 {offsets = [0, 16], sizes = [8, 8], strides = [1, 1]} : vector<8x32xf32> to vector<8x8xf32>
    %cst_37 = arith.constant 0.353553385 : f32
    %76 = vector.broadcast %cst_37 : f32 to vector<8x8xf32>
    %77 = arith.mulf %75, %76 : vector<8x8xf32>
    %78 = arith.truncf %77 : vector<8x8xf32> to vector<8x8xbf16>
    %79 = vector.extract_strided_slice %26 {offsets = [0, 16], sizes = [8, 8], strides = [1, 1]} : vector<8x32xf32> to vector<8x8xf32>
    %80 = tpu.transpose %79, [1, 0] : vector<8x8xf32> -> vector<8x8xf32>
    %81 = arith.truncf %80 : vector<8x8xf32> to vector<8x8xbf16>
    %cst_38 = arith.constant dense<0.000000e+00> : vector<8x8xf32>
    %82 = tpu.matmul %78, %81, %cst_38 {dimension_numbers = #tpu.dot_dimension_numbers<[1], [0], [0], [1], [0, 0, 1, 1], [], []>} : vector<8x8xbf16>, vector<8x8xbf16>, vector<8x8xf32> -> vector<8x8xf32>
    %cst_39 = arith.constant dense<0xFF800000> : vector<8xf32>
    %83 = vector.multi_reduction <maximumf>, %82, %cst_39 [1] : vector<8x8xf32> to vector<8xf32>
    %84 = vector.shape_cast %83 : vector<8xf32> to vector<8x1xf32>
    %85 = vector.broadcast %84 : vector<8x1xf32> to vector<8x8xf32>
    %86 = arith.subf %82, %85 : vector<8x8xf32>
    %87 = math.exp %86 : vector<8x8xf32>
    %cst_40 = arith.constant dense<0.000000e+00> : vector<8xf32>
    %88 = vector.multi_reduction <add>, %87, %cst_40 [1] : vector<8x8xf32> to vector<8xf32>
    %89 = vector.shape_cast %88 : vector<8xf32> to vector<8x1xf32>
    %90 = tpu.reciprocal %89 {approx = true} : vector<8x1xf32> -> vector<8x1xf32>
    %91 = vector.broadcast %90 : vector<8x1xf32> to vector<8x8xf32>
    %92 = arith.mulf %87, %91 : vector<8x8xf32>
    %93 = arith.truncf %92 : vector<8x8xf32> to vector<8x8xbf16>
    %94 = vector.extract_strided_slice %24 {offsets = [0, 16], sizes = [8, 8], strides = [1, 1]} : vector<8x32xf32> to vector<8x8xf32>
    %95 = arith.truncf %94 : vector<8x8xf32> to vector<8x8xbf16>
    %cst_41 = arith.constant dense<0.000000e+00> : vector<8x8xf32>
    %96 = tpu.matmul %93, %95, %cst_41 {dimension_numbers = #tpu.dot_dimension_numbers<[1], [0], [0], [1], [0, 0, 1, 1], [], []>} : vector<8x8xbf16>, vector<8x8xbf16>, vector<8x8xf32> -> vector<8x8xf32>
    %c0_42 = arith.constant 0 : index
    %c16 = arith.constant 16 : index
    %97 = vector.load %arg24[%c0_42, %c16] : memref<8x32xf32, #tpu.memory_space<vmem>>, vector<8x8xf32>
    tpu.vector_store %arg24[%c0_42, %c16], %96 {strides = array<i32>} : memref<8x32xf32, #tpu.memory_space<vmem>>, vector<8x8xf32>,
    %98 = vector.extract_strided_slice %25 {offsets = [0, 24], sizes = [8, 8], strides = [1, 1]} : vector<8x32xf32> to vector<8x8xf32>
    %cst_43 = arith.constant 0.353553385 : f32
    %99 = vector.broadcast %cst_43 : f32 to vector<8x8xf32>
    %100 = arith.mulf %98, %99 : vector<8x8xf32>
    %101 = arith.truncf %100 : vector<8x8xf32> to vector<8x8xbf16>
    %102 = vector.extract_strided_slice %26 {offsets = [0, 24], sizes = [8, 8], strides = [1, 1]} : vector<8x32xf32> to vector<8x8xf32>
    %103 = tpu.transpose %102, [1, 0] : vector<8x8xf32> -> vector<8x8xf32>
    %104 = arith.truncf %103 : vector<8x8xf32> to vector<8x8xbf16>
    %cst_44 = arith.constant dense<0.000000e+00> : vector<8x8xf32>
    %105 = tpu.matmul %101, %104, %cst_44 {dimension_numbers = #tpu.dot_dimension_numbers<[1], [0], [0], [1], [0, 0, 1, 1], [], []>} : vector<8x8xbf16>, vector<8x8xbf16>, vector<8x8xf32> -> vector<8x8xf32>
    %cst_45 = arith.constant dense<0xFF800000> : vector<8xf32>
    %106 = vector.multi_reduction <maximumf>, %105, %cst_45 [1] : vector<8x8xf32> to vector<8xf32>
    %107 = vector.shape_cast %106 : vector<8xf32> to vector<8x1xf32>
    %108 = vector.broadcast %107 : vector<8x1xf32> to vector<8x8xf32>
    %109 = arith.subf %105, %108 : vector<8x8xf32>
    %110 = math.exp %109 : vector<8x8xf32>
    %cst_46 = arith.constant dense<0.000000e+00> : vector<8xf32>
    %111 = vector.multi_reduction <add>, %110, %cst_46 [1] : vector<8x8xf32> to vector<8xf32>
    %112 = vector.shape_cast %111 : vector<8xf32> to vector<8x1xf32>
    %113 = tpu.reciprocal %112 {approx = true} : vector<8x1xf32> -> vector<8x1xf32>
    %114 = vector.broadcast %113 : vector<8x1xf32> to vector<8x8xf32>
    %115 = arith.mulf %110, %114 : vector<8x8xf32>
    %116 = arith.truncf %115 : vector<8x8xf32> to vector<8x8xbf16>
    %117 = vector.extract_strided_slice %24 {offsets = [0, 24], sizes = [8, 8], strides = [1, 1]} : vector<8x32xf32> to vector<8x8xf32>
    %118 = arith.truncf %117 : vector<8x8xf32> to vector<8x8xbf16>
    %cst_47 = arith.constant dense<0.000000e+00> : vector<8x8xf32>
    %119 = tpu.matmul %116, %118, %cst_47 {dimension_numbers = #tpu.dot_dimension_numbers<[1], [0], [0], [1], [0, 0, 1, 1], [], []>} : vector<8x8xbf16>, vector<8x8xbf16>, vector<8x8xf32> -> vector<8x8xf32>
    %c0_48 = arith.constant 0 : index
    %c24 = arith.constant 24 : index
    %120 = vector.load %arg24[%c0_48, %c24] : memref<8x32xf32, #tpu.memory_space<vmem>>, vector<8x8xf32>
    tpu.vector_store %arg24[%c0_48, %c24], %119 {strides = array<i32>} : memref<8x32xf32, #tpu.memory_space<vmem>>, vector<8x8xf32>,
    %c0_49 = arith.constant 0 : index
    %c0_50 = arith.constant 0 : index
    %121 = vector.load %arg24[%c0_49, %c0_50] : memref<8x32xf32, #tpu.memory_space<vmem>>, vector<8x32xf32>
    %122 = arith.truncf %121 : vector<8x32xf32> to vector<8x32xbf16>
    %cst_51 = arith.constant dense<0.000000e+00> : vector<8x32xf32>
    %123 = tpu.matmul %122, %27, %cst_51 {dimension_numbers = #tpu.dot_dimension_numbers<[1], [0], [0], [1], [0, 0, 1, 1], [], []>} : vector<8x32xbf16>, vector<32x32xbf16>, vector<8x32xf32> -> vector<8x32xf32>
    %124 = vector.broadcast %28 : vector<1x32xf32> to vector<8x32xf32>
    %125 = arith.addf %123, %124 : vector<8x32xf32>
    %126 = arith.addf %1, %125 : vector<8x32xf32>
    %c0_52 = arith.constant 0 : index
    %c0_53 = arith.constant 0 : index
    %127 = vector.load %arg17[%c0_52, %c0_53] : memref<1x32xf32, #tpu.memory_space<vmem>>, vector<1x32xf32>
    %c0_54 = arith.constant 0 : index
    %c0_55 = arith.constant 0 : index
    %128 = vector.load %arg18[%c0_54, %c0_55] : memref<1x32xf32, #tpu.memory_space<vmem>>, vector<1x32xf32>
    %cst_56 = arith.constant dense<0.000000e+00> : vector<8xf32>
    %129 = vector.multi_reduction <add>, %126, %cst_56 [1] : vector<8x32xf32> to vector<8xf32>
    %130 = vector.shape_cast %129 : vector<8xf32> to vector<8x1xf32>
    %cst_57 = arith.constant 3.200000e+01 : f32
    %131 = vector.broadcast %cst_57 : f32 to vector<8x1xf32>
    %132 = arith.divf %130, %131 : vector<8x1xf32>
    %133 = vector.broadcast %132 : vector<8x1xf32> to vector<8x32xf32>
    %134 = arith.subf %126, %133 : vector<8x32xf32>
    %135 = arith.mulf %134, %134 : vector<8x32xf32>
    %cst_58 = arith.constant dense<0.000000e+00> : vector<8xf32>
    %136 = vector.multi_reduction <add>, %135, %cst_58 [1] : vector<8x32xf32> to vector<8xf32>
    %137 = vector.shape_cast %136 : vector<8xf32> to vector<8x1xf32>
    %cst_59 = arith.constant 3.200000e+01 : f32
    %138 = vector.broadcast %cst_59 : f32 to vector<8x1xf32>
    %139 = arith.divf %137, %138 : vector<8x1xf32>
    %140 = vector.broadcast %132 : vector<8x1xf32> to vector<8x32xf32>
    %141 = arith.subf %126, %140 : vector<8x32xf32>
    %cst_60 = arith.constant 9.99999974E-6 : f32
    %142 = vector.broadcast %cst_60 : f32 to vector<8x1xf32>
    %143 = arith.addf %139, %142 : vector<8x1xf32>
    %144 = math.rsqrt %143 : vector<8x1xf32>
    %145 = vector.broadcast %144 : vector<8x1xf32> to vector<8x32xf32>
    %146 = arith.mulf %141, %145 : vector<8x32xf32>
    %147 = vector.broadcast %127 : vector<1x32xf32> to vector<8x32xf32>
    %148 = arith.mulf %146, %147 : vector<8x32xf32>
    %149 = vector.broadcast %128 : vector<1x32xf32> to vector<8x32xf32>
    %150 = arith.addf %148, %149 : vector<8x32xf32>
    %151 = arith.addf %150, %5 : vector<8x32xf32>
    %152 = vector.extract_strided_slice %10 {offsets = [0, 0], sizes = [32, 32], strides = [1, 1]} : vector<32x96xbf16> to vector<32x32xbf16>
    %153 = arith.truncf %151 : vector<8x32xf32> to vector<8x32xbf16>
    %cst_61 = arith.constant dense<0.000000e+00> : vector<8x32xf32>
    %154 = tpu.matmul %153, %152, %cst_61 {dimension_numbers = #tpu.dot_dimension_numbers<[1], [0], [0], [1], [0, 0, 1, 1], [], []>} : vector<8x32xbf16>, vector<32x32xbf16>, vector<8x32xf32> -> vector<8x32xf32>
    %155 = vector.extract_strided_slice %11 {offsets = [0, 0], sizes = [1, 32], strides = [1, 1]} : vector<1x96xf32> to vector<1x32xf32>
    %156 = vector.broadcast %155 : vector<1x32xf32> to vector<8x32xf32>
    %157 = arith.addf %154, %156 : vector<8x32xf32>
    %158 = arith.addf %3, %7 : vector<12x32xf32>
    %159 = vector.extract_strided_slice %10 {offsets = [0, 32], sizes = [32, 32], strides = [1, 1]} : vector<32x96xbf16> to vector<32x32xbf16>
    %160 = arith.truncf %158 : vector<12x32xf32> to vector<12x32xbf16>
    %cst_62 = arith.constant dense<0.000000e+00> : vector<12x32xf32>
    %161 = tpu.matmul %160, %159, %cst_62 {dimension_numbers = #tpu.dot_dimension_numbers<[1], [0], [0], [1], [0, 0, 1, 1], [], []>} : vector<12x32xbf16>, vector<32x32xbf16>, vector<12x32xf32> -> vector<12x32xf32>
    %162 = vector.extract_strided_slice %11 {offsets = [0, 32], sizes = [1, 32], strides = [1, 1]} : vector<1x96xf32> to vector<1x32xf32>
    %163 = vector.broadcast %162 : vector<1x32xf32> to vector<12x32xf32>
    %164 = arith.addf %161, %163 : vector<12x32xf32>
    %165 = vector.extract_strided_slice %10 {offsets = [0, 64], sizes = [32, 32], strides = [1, 1]} : vector<32x96xbf16> to vector<32x32xbf16>
    %166 = arith.truncf %3 : vector<12x32xf32> to vector<12x32xbf16>
    %cst_63 = arith.constant dense<0.000000e+00> : vector<12x32xf32>
    %167 = tpu.matmul %166, %165, %cst_63 {dimension_numbers = #tpu.dot_dimension_numbers<[1], [0], [0], [1], [0, 0, 1, 1], [], []>} : vector<12x32xbf16>, vector<32x32xbf16>, vector<12x32xf32> -> vector<12x32xf32>
    %168 = vector.extract_strided_slice %11 {offsets = [0, 64], sizes = [1, 32], strides = [1, 1]} : vector<1x96xf32> to vector<1x32xf32>
    %169 = vector.broadcast %168 : vector<1x32xf32> to vector<12x32xf32>
    %170 = arith.addf %167, %169 : vector<12x32xf32>
    %c0_64 = arith.constant 0 : index
    %c0_65 = arith.constant 0 : index
    %171 = vector.load %arg11[%c0_64, %c0_65] : memref<32x32xbf16, #tpu.memory_space<vmem>>, vector<32x32xbf16>
    %c0_66 = arith.constant 0 : index
    %c0_67 = arith.constant 0 : index
    %172 = vector.load %arg12[%c0_66, %c0_67] : memref<1x32xf32, #tpu.memory_space<vmem>>, vector<1x32xf32>
    %173 = vector.extract_strided_slice %157 {offsets = [0, 0], sizes = [8, 8], strides = [1, 1]} : vector<8x32xf32> to vector<8x8xf32>
    %cst_68 = arith.constant 0.353553385 : f32
    %174 = vector.broadcast %cst_68 : f32 to vector<8x8xf32>
    %175 = arith.mulf %173, %174 : vector<8x8xf32>
    %176 = arith.truncf %175 : vector<8x8xf32> to vector<8x8xbf16>
    %177 = vector.extract_strided_slice %164 {offsets = [0, 0], sizes = [12, 8], strides = [1, 1]} : vector<12x32xf32> to vector<12x8xf32>
    %178 = tpu.transpose %177, [1, 0] : vector<12x8xf32> -> vector<8x12xf32>
    %179 = arith.truncf %178 : vector<8x12xf32> to vector<8x12xbf16>
    %cst_69 = arith.constant dense<0.000000e+00> : vector<8x12xf32>
    %180 = tpu.matmul %176, %179, %cst_69 {dimension_numbers = #tpu.dot_dimension_numbers<[1], [0], [0], [1], [0, 0, 1, 1], [], []>} : vector<8x8xbf16>, vector<8x12xbf16>, vector<8x12xf32> -> vector<8x12xf32>
    %cst_70 = arith.constant dense<0xFF800000> : vector<8xf32>
    %181 = vector.multi_reduction <maximumf>, %180, %cst_70 [1] : vector<8x12xf32> to vector<8xf32>
    %182 = vector.shape_cast %181 : vector<8xf32> to vector<8x1xf32>
    %183 = vector.broadcast %182 : vector<8x1xf32> to vector<8x12xf32>
    %184 = arith.subf %180, %183 : vector<8x12xf32>
    %185 = math.exp %184 : vector<8x12xf32>
    %cst_71 = arith.constant dense<0.000000e+00> : vector<8xf32>
    %186 = vector.multi_reduction <add>, %185, %cst_71 [1] : vector<8x12xf32> to vector<8xf32>
    %187 = vector.shape_cast %186 : vector<8xf32> to vector<8x1xf32>
    %188 = tpu.reciprocal %187 {approx = true} : vector<8x1xf32> -> vector<8x1xf32>
    %189 = vector.broadcast %188 : vector<8x1xf32> to vector<8x12xf32>
    %190 = arith.mulf %185, %189 : vector<8x12xf32>
    %191 = arith.truncf %190 : vector<8x12xf32> to vector<8x12xbf16>
    %192 = vector.extract_strided_slice %170 {offsets = [0, 0], sizes = [12, 8], strides = [1, 1]} : vector<12x32xf32> to vector<12x8xf32>
    %193 = arith.truncf %192 : vector<12x8xf32> to vector<12x8xbf16>
    %cst_72 = arith.constant dense<0.000000e+00> : vector<8x8xf32>
    %194 = tpu.matmul %191, %193, %cst_72 {dimension_numbers = #tpu.dot_dimension_numbers<[1], [0], [0], [1], [0, 0, 1, 1], [], []>} : vector<8x12xbf16>, vector<12x8xbf16>, vector<8x8xf32> -> vector<8x8xf32>
    %c0_73 = arith.constant 0 : index
    %c0_74 = arith.constant 0 : index
    %195 = vector.load %arg24[%c0_73, %c0_74] : memref<8x32xf32, #tpu.memory_space<vmem>>, vector<8x8xf32>
    tpu.vector_store %arg24[%c0_73, %c0_74], %194 {strides = array<i32>} : memref<8x32xf32, #tpu.memory_space<vmem>>, vector<8x8xf32>,
    %196 = vector.extract_strided_slice %157 {offsets = [0, 8], sizes = [8, 8], strides = [1, 1]} : vector<8x32xf32> to vector<8x8xf32>
    %cst_75 = arith.constant 0.353553385 : f32
    %197 = vector.broadcast %cst_75 : f32 to vector<8x8xf32>
    %198 = arith.mulf %196, %197 : vector<8x8xf32>
    %199 = arith.truncf %198 : vector<8x8xf32> to vector<8x8xbf16>
    %200 = vector.extract_strided_slice %164 {offsets = [0, 8], sizes = [12, 8], strides = [1, 1]} : vector<12x32xf32> to vector<12x8xf32>
    %201 = tpu.transpose %200, [1, 0] : vector<12x8xf32> -> vector<8x12xf32>
    %202 = arith.truncf %201 : vector<8x12xf32> to vector<8x12xbf16>
    %cst_76 = arith.constant dense<0.000000e+00> : vector<8x12xf32>
    %203 = tpu.matmul %199, %202, %cst_76 {dimension_numbers = #tpu.dot_dimension_numbers<[1], [0], [0], [1], [0, 0, 1, 1], [], []>} : vector<8x8xbf16>, vector<8x12xbf16>, vector<8x12xf32> -> vector<8x12xf32>
    %cst_77 = arith.constant dense<0xFF800000> : vector<8xf32>
    %204 = vector.multi_reduction <maximumf>, %203, %cst_77 [1] : vector<8x12xf32> to vector<8xf32>
    %205 = vector.shape_cast %204 : vector<8xf32> to vector<8x1xf32>
    %206 = vector.broadcast %205 : vector<8x1xf32> to vector<8x12xf32>
    %207 = arith.subf %203, %206 : vector<8x12xf32>
    %208 = math.exp %207 : vector<8x12xf32>
    %cst_78 = arith.constant dense<0.000000e+00> : vector<8xf32>
    %209 = vector.multi_reduction <add>, %208, %cst_78 [1] : vector<8x12xf32> to vector<8xf32>
    %210 = vector.shape_cast %209 : vector<8xf32> to vector<8x1xf32>
    %211 = tpu.reciprocal %210 {approx = true} : vector<8x1xf32> -> vector<8x1xf32>
    %212 = vector.broadcast %211 : vector<8x1xf32> to vector<8x12xf32>
    %213 = arith.mulf %208, %212 : vector<8x12xf32>
    %214 = arith.truncf %213 : vector<8x12xf32> to vector<8x12xbf16>
    %215 = vector.extract_strided_slice %170 {offsets = [0, 8], sizes = [12, 8], strides = [1, 1]} : vector<12x32xf32> to vector<12x8xf32>
    %216 = arith.truncf %215 : vector<12x8xf32> to vector<12x8xbf16>
    %cst_79 = arith.constant dense<0.000000e+00> : vector<8x8xf32>
    %217 = tpu.matmul %214, %216, %cst_79 {dimension_numbers = #tpu.dot_dimension_numbers<[1], [0], [0], [1], [0, 0, 1, 1], [], []>} : vector<8x12xbf16>, vector<12x8xbf16>, vector<8x8xf32> -> vector<8x8xf32>
    %c0_80 = arith.constant 0 : index
    %c8_81 = arith.constant 8 : index
    %218 = vector.load %arg24[%c0_80, %c8_81] : memref<8x32xf32, #tpu.memory_space<vmem>>, vector<8x8xf32>
    tpu.vector_store %arg24[%c0_80, %c8_81], %217 {strides = array<i32>} : memref<8x32xf32, #tpu.memory_space<vmem>>, vector<8x8xf32>,
    %219 = vector.extract_strided_slice %157 {offsets = [0, 16], sizes = [8, 8], strides = [1, 1]} : vector<8x32xf32> to vector<8x8xf32>
    %cst_82 = arith.constant 0.353553385 : f32
    %220 = vector.broadcast %cst_82 : f32 to vector<8x8xf32>
    %221 = arith.mulf %219, %220 : vector<8x8xf32>
    %222 = arith.truncf %221 : vector<8x8xf32> to vector<8x8xbf16>
    %223 = vector.extract_strided_slice %164 {offsets = [0, 16], sizes = [12, 8], strides = [1, 1]} : vector<12x32xf32> to vector<12x8xf32>
    %224 = tpu.transpose %223, [1, 0] : vector<12x8xf32> -> vector<8x12xf32>
    %225 = arith.truncf %224 : vector<8x12xf32> to vector<8x12xbf16>
    %cst_83 = arith.constant dense<0.000000e+00> : vector<8x12xf32>
    %226 = tpu.matmul %222, %225, %cst_83 {dimension_numbers = #tpu.dot_dimension_numbers<[1], [0], [0], [1], [0, 0, 1, 1], [], []>} : vector<8x8xbf16>, vector<8x12xbf16>, vector<8x12xf32> -> vector<8x12xf32>
    %cst_84 = arith.constant dense<0xFF800000> : vector<8xf32>
    %227 = vector.multi_reduction <maximumf>, %226, %cst_84 [1] : vector<8x12xf32> to vector<8xf32>
    %228 = vector.shape_cast %227 : vector<8xf32> to vector<8x1xf32>
    %229 = vector.broadcast %228 : vector<8x1xf32> to vector<8x12xf32>
    %230 = arith.subf %226, %229 : vector<8x12xf32>
    %231 = math.exp %230 : vector<8x12xf32>
    %cst_85 = arith.constant dense<0.000000e+00> : vector<8xf32>
    %232 = vector.multi_reduction <add>, %231, %cst_85 [1] : vector<8x12xf32> to vector<8xf32>
    %233 = vector.shape_cast %232 : vector<8xf32> to vector<8x1xf32>
    %234 = tpu.reciprocal %233 {approx = true} : vector<8x1xf32> -> vector<8x1xf32>
    %235 = vector.broadcast %234 : vector<8x1xf32> to vector<8x12xf32>
    %236 = arith.mulf %231, %235 : vector<8x12xf32>
    %237 = arith.truncf %236 : vector<8x12xf32> to vector<8x12xbf16>
    %238 = vector.extract_strided_slice %170 {offsets = [0, 16], sizes = [12, 8], strides = [1, 1]} : vector<12x32xf32> to vector<12x8xf32>
    %239 = arith.truncf %238 : vector<12x8xf32> to vector<12x8xbf16>
    %cst_86 = arith.constant dense<0.000000e+00> : vector<8x8xf32>
    %240 = tpu.matmul %237, %239, %cst_86 {dimension_numbers = #tpu.dot_dimension_numbers<[1], [0], [0], [1], [0, 0, 1, 1], [], []>} : vector<8x12xbf16>, vector<12x8xbf16>, vector<8x8xf32> -> vector<8x8xf32>
    %c0_87 = arith.constant 0 : index
    %c16_88 = arith.constant 16 : index
    %241 = vector.load %arg24[%c0_87, %c16_88] : memref<8x32xf32, #tpu.memory_space<vmem>>, vector<8x8xf32>
    tpu.vector_store %arg24[%c0_87, %c16_88], %240 {strides = array<i32>} : memref<8x32xf32, #tpu.memory_space<vmem>>, vector<8x8xf32>,
    %242 = vector.extract_strided_slice %157 {offsets = [0, 24], sizes = [8, 8], strides = [1, 1]} : vector<8x32xf32> to vector<8x8xf32>
    %cst_89 = arith.constant 0.353553385 : f32
    %243 = vector.broadcast %cst_89 : f32 to vector<8x8xf32>
    %244 = arith.mulf %242, %243 : vector<8x8xf32>
    %245 = arith.truncf %244 : vector<8x8xf32> to vector<8x8xbf16>
    %246 = vector.extract_strided_slice %164 {offsets = [0, 24], sizes = [12, 8], strides = [1, 1]} : vector<12x32xf32> to vector<12x8xf32>
    %247 = tpu.transpose %246, [1, 0] : vector<12x8xf32> -> vector<8x12xf32>
    %248 = arith.truncf %247 : vector<8x12xf32> to vector<8x12xbf16>
    %cst_90 = arith.constant dense<0.000000e+00> : vector<8x12xf32>
    %249 = tpu.matmul %245, %248, %cst_90 {dimension_numbers = #tpu.dot_dimension_numbers<[1], [0], [0], [1], [0, 0, 1, 1], [], []>} : vector<8x8xbf16>, vector<8x12xbf16>, vector<8x12xf32> -> vector<8x12xf32>
    %cst_91 = arith.constant dense<0xFF800000> : vector<8xf32>
    %250 = vector.multi_reduction <maximumf>, %249, %cst_91 [1] : vector<8x12xf32> to vector<8xf32>
    %251 = vector.shape_cast %250 : vector<8xf32> to vector<8x1xf32>
    %252 = vector.broadcast %251 : vector<8x1xf32> to vector<8x12xf32>
    %253 = arith.subf %249, %252 : vector<8x12xf32>
    %254 = math.exp %253 : vector<8x12xf32>
    %cst_92 = arith.constant dense<0.000000e+00> : vector<8xf32>
    %255 = vector.multi_reduction <add>, %254, %cst_92 [1] : vector<8x12xf32> to vector<8xf32>
    %256 = vector.shape_cast %255 : vector<8xf32> to vector<8x1xf32>
    %257 = tpu.reciprocal %256 {approx = true} : vector<8x1xf32> -> vector<8x1xf32>
    %258 = vector.broadcast %257 : vector<8x1xf32> to vector<8x12xf32>
    %259 = arith.mulf %254, %258 : vector<8x12xf32>
    %260 = arith.truncf %259 : vector<8x12xf32> to vector<8x12xbf16>
    %261 = vector.extract_strided_slice %170 {offsets = [0, 24], sizes = [12, 8], strides = [1, 1]} : vector<12x32xf32> to vector<12x8xf32>
    %262 = arith.truncf %261 : vector<12x8xf32> to vector<12x8xbf16>
    %cst_93 = arith.constant dense<0.000000e+00> : vector<8x8xf32>
    %263 = tpu.matmul %260, %262, %cst_93 {dimension_numbers = #tpu.dot_dimension_numbers<[1], [0], [0], [1], [0, 0, 1, 1], [], []>} : vector<8x12xbf16>, vector<12x8xbf16>, vector<8x8xf32> -> vector<8x8xf32>
    %c0_94 = arith.constant 0 : index
    %c24_95 = arith.constant 24 : index
    %264 = vector.load %arg24[%c0_94, %c24_95] : memref<8x32xf32, #tpu.memory_space<vmem>>, vector<8x8xf32>
    tpu.vector_store %arg24[%c0_94, %c24_95], %263 {strides = array<i32>} : memref<8x32xf32, #tpu.memory_space<vmem>>, vector<8x8xf32>,
    %c0_96 = arith.constant 0 : index
    %c0_97 = arith.constant 0 : index
    %265 = vector.load %arg24[%c0_96, %c0_97] : memref<8x32xf32, #tpu.memory_space<vmem>>, vector<8x32xf32>
    %266 = arith.truncf %265 : vector<8x32xf32> to vector<8x32xbf16>
    %cst_98 = arith.constant dense<0.000000e+00> : vector<8x32xf32>
    %267 = tpu.matmul %266, %171, %cst_98 {dimension_numbers = #tpu.dot_dimension_numbers<[1], [0], [0], [1], [0, 0, 1, 1], [], []>} : vector<8x32xbf16>, vector<32x32xbf16>, vector<8x32xf32> -> vector<8x32xf32>
    %268 = vector.broadcast %172 : vector<1x32xf32> to vector<8x32xf32>
    %269 = arith.addf %267, %268 : vector<8x32xf32>
    %270 = arith.addf %150, %269 : vector<8x32xf32>
    %c0_99 = arith.constant 0 : index
    %c0_100 = arith.constant 0 : index
    %271 = vector.load %arg19[%c0_99, %c0_100] : memref<1x32xf32, #tpu.memory_space<vmem>>, vector<1x32xf32>
    %c0_101 = arith.constant 0 : index
    %c0_102 = arith.constant 0 : index
    %272 = vector.load %arg20[%c0_101, %c0_102] : memref<1x32xf32, #tpu.memory_space<vmem>>, vector<1x32xf32>
    %cst_103 = arith.constant dense<0.000000e+00> : vector<8xf32>
    %273 = vector.multi_reduction <add>, %270, %cst_103 [1] : vector<8x32xf32> to vector<8xf32>
    %274 = vector.shape_cast %273 : vector<8xf32> to vector<8x1xf32>
    %cst_104 = arith.constant 3.200000e+01 : f32
    %275 = vector.broadcast %cst_104 : f32 to vector<8x1xf32>
    %276 = arith.divf %274, %275 : vector<8x1xf32>
    %277 = vector.broadcast %276 : vector<8x1xf32> to vector<8x32xf32>
    %278 = arith.subf %270, %277 : vector<8x32xf32>
    %279 = arith.mulf %278, %278 : vector<8x32xf32>
    %cst_105 = arith.constant dense<0.000000e+00> : vector<8xf32>
    %280 = vector.multi_reduction <add>, %279, %cst_105 [1] : vector<8x32xf32> to vector<8xf32>
    %281 = vector.shape_cast %280 : vector<8xf32> to vector<8x1xf32>
    %cst_106 = arith.constant 3.200000e+01 : f32
    %282 = vector.broadcast %cst_106 : f32 to vector<8x1xf32>
    %283 = arith.divf %281, %282 : vector<8x1xf32>
    %284 = vector.broadcast %276 : vector<8x1xf32> to vector<8x32xf32>
    %285 = arith.subf %270, %284 : vector<8x32xf32>
    %cst_107 = arith.constant 9.99999974E-6 : f32
    %286 = vector.broadcast %cst_107 : f32 to vector<8x1xf32>
    %287 = arith.addf %283, %286 : vector<8x1xf32>
    %288 = math.rsqrt %287 : vector<8x1xf32>
    %289 = vector.broadcast %288 : vector<8x1xf32> to vector<8x32xf32>
    %290 = arith.mulf %285, %289 : vector<8x32xf32>
    %291 = vector.broadcast %271 : vector<1x32xf32> to vector<8x32xf32>
    %292 = arith.mulf %290, %291 : vector<8x32xf32>
    %293 = vector.broadcast %272 : vector<1x32xf32> to vector<8x32xf32>
    %294 = arith.addf %292, %293 : vector<8x32xf32>
    %c0_108 = arith.constant 0 : index
    %c0_109 = arith.constant 0 : index
    %295 = vector.load %arg13[%c0_108, %c0_109] : memref<32x64xbf16, #tpu.memory_space<vmem>>, vector<32x64xbf16>
    %296 = arith.truncf %294 : vector<8x32xf32> to vector<8x32xbf16>
    %cst_110 = arith.constant dense<0.000000e+00> : vector<8x64xf32>
    %297 = tpu.matmul %296, %295, %cst_110 {dimension_numbers = #tpu.dot_dimension_numbers<[1], [0], [0], [1], [0, 0, 1, 1], [], []>} : vector<8x32xbf16>, vector<32x64xbf16>, vector<8x64xf32> -> vector<8x64xf32>
    %c0_111 = arith.constant 0 : index
    %c0_112 = arith.constant 0 : index
    %298 = vector.load %arg14[%c0_111, %c0_112] : memref<1x64xf32, #tpu.memory_space<vmem>>, vector<1x64xf32>
    %299 = vector.broadcast %298 : vector<1x64xf32> to vector<8x64xf32>
    %300 = arith.addf %297, %299 : vector<8x64xf32>
    %cst_113 = arith.constant 0.000000e+00 : f32
    %301 = vector.broadcast %cst_113 : f32 to vector<8x64xf32>
    %302 = arith.maximumf %300, %301 : vector<8x64xf32>
    %c0_114 = arith.constant 0 : index
    %c0_115 = arith.constant 0 : index
    %303 = vector.load %arg15[%c0_114, %c0_115] : memref<64x32xbf16, #tpu.memory_space<vmem>>, vector<64x32xbf16>
    %304 = arith.truncf %302 : vector<8x64xf32> to vector<8x64xbf16>
    %cst_116 = arith.constant dense<0.000000e+00> : vector<8x32xf32>
    %305 = tpu.matmul %304, %303, %cst_116 {dimension_numbers = #tpu.dot_dimension_numbers<[1], [0], [0], [1], [0, 0, 1, 1], [], []>} : vector<8x64xbf16>, vector<64x32xbf16>, vector<8x32xf32> -> vector<8x32xf32>
    %c0_117 = arith.constant 0 : index
    %c0_118 = arith.constant 0 : index
    %306 = vector.load %arg16[%c0_117, %c0_118] : memref<1x32xf32, #tpu.memory_space<vmem>>, vector<1x32xf32>
    %307 = vector.broadcast %306 : vector<1x32xf32> to vector<8x32xf32>
    %308 = arith.addf %305, %307 : vector<8x32xf32>
    %309 = arith.addf %294, %308 : vector<8x32xf32>
    %c0_119 = arith.constant 0 : index
    %c0_120 = arith.constant 0 : index
    %310 = vector.load %arg21[%c0_119, %c0_120] : memref<1x32xf32, #tpu.memory_space<vmem>>, vector<1x32xf32>
    %c0_121 = arith.constant 0 : index
    %c0_122 = arith.constant 0 : index
    %311 = vector.load %arg22[%c0_121, %c0_122] : memref<1x32xf32, #tpu.memory_space<vmem>>, vector<1x32xf32>
    %cst_123 = arith.constant dense<0.000000e+00> : vector<8xf32>
    %312 = vector.multi_reduction <add>, %309, %cst_123 [1] : vector<8x32xf32> to vector<8xf32>
    %313 = vector.shape_cast %312 : vector<8xf32> to vector<8x1xf32>
    %cst_124 = arith.constant 3.200000e+01 : f32
    %314 = vector.broadcast %cst_124 : f32 to vector<8x1xf32>
    %315 = arith.divf %313, %314 : vector<8x1xf32>
    %316 = vector.broadcast %315 : vector<8x1xf32> to vector<8x32xf32>
    %317 = arith.subf %309, %316 : vector<8x32xf32>
    %318 = arith.mulf %317, %317 : vector<8x32xf32>
    %cst_125 = arith.constant dense<0.000000e+00> : vector<8xf32>
    %319 = vector.multi_reduction <add>, %318, %cst_125 [1] : vector<8x32xf32> to vector<8xf32>
    %320 = vector.shape_cast %319 : vector<8xf32> to vector<8x1xf32>
    %cst_126 = arith.constant 3.200000e+01 : f32
    %321 = vector.broadcast %cst_126 : f32 to vector<8x1xf32>
    %322 = arith.divf %320, %321 : vector<8x1xf32>
    %323 = vector.broadcast %315 : vector<8x1xf32> to vector<8x32xf32>
    %324 = arith.subf %309, %323 : vector<8x32xf32>
    %cst_127 = arith.constant 9.99999974E-6 : f32
    %325 = vector.broadcast %cst_127 : f32 to vector<8x1xf32>
    %326 = arith.addf %322, %325 : vector<8x1xf32>
    %327 = math.rsqrt %326 : vector<8x1xf32>
    %328 = vector.broadcast %327 : vector<8x1xf32> to vector<8x32xf32>
    %329 = arith.mulf %324, %328 : vector<8x32xf32>
    %330 = vector.broadcast %310 : vector<1x32xf32> to vector<8x32xf32>
    %331 = arith.mulf %329, %330 : vector<8x32xf32>
    %332 = vector.broadcast %311 : vector<1x32xf32> to vector<8x32xf32>
    %333 = arith.addf %331, %332 : vector<8x32xf32>
    %c0_128 = arith.constant 0 : index
    %c0_129 = arith.constant 0 : index
    %c0_130 = arith.constant 0 : index
    %334 = vector.load %arg23[%c0_128, %c0_129, %c0_130] : memref<1x8x32xf32, #tpu.memory_space<vmem>>, vector<1x8x32xf32>
    %335 = vector.shape_cast %334 : vector<1x8x32xf32> to vector<8x32xf32>
    %336 = vector.shape_cast %333 : vector<8x32xf32> to vector<1x8x32xf32>
    tpu.vector_store %arg23[%c0_128, %c0_129, %c0_130], %336 {strides = array<i32>} : memref<1x8x32xf32, #tpu.memory_space<vmem>>, vector<1x8x32xf32>,
    return
  }
  func.func @transform_0(%arg0: i32) -> (i32, i32, i32) {
    %c0_i32 = arith.constant 0 : i32
    %c0_i32_0 = arith.constant 0 : i32
    %c0_i32_1 = arith.constant 0 : i32
    return %arg0, %c0_i32, %c0_i32_0 : i32, i32, i32
  }
  func.func @transform_1(%arg0: i32) -> (i32, i32, i32) {
    %c0_i32 = arith.constant 0 : i32
    %c0_i32_0 = arith.constant 0 : i32
    %c0_i32_1 = arith.constant 0 : i32
    return %arg0, %c0_i32, %c0_i32_0 : i32, i32, i32
  }
  func.func @transform_2(%arg0: i32) -> (i32, i32, i32) {
    %c0_i32 = arith.constant 0 : i32
    %c0_i32_0 = arith.constant 0 : i32
    %c0_i32_1 = arith.constant 0 : i32
    return %arg0, %c0_i32, %c0_i32_0 : i32, i32, i32
  }
  func.func @transform_3(%arg0: i32) -> (i32, i32, i32) {
    %c0_i32 = arith.constant 0 : i32
    %c0_i32_0 = arith.constant 0 : i32
    %c0_i32_1 = arith.constant 0 : i32
    return %arg0, %c0_i32, %c0_i32_0 : i32, i32, i32
  }
  func.func @transform_4(%arg0: i32) -> (i32, i32) {
    %c0_i32 = arith.constant 0 : i32
    %c0_i32_0 = arith.constant 0 : i32
    %c0_i32_1 = arith.constant 0 : i32
    return %c0_i32, %c0_i32_0 : i32, i32
  }
  func.func @transform_5(%arg0: i32) -> (i32, i32) {
    %c0_i32 = arith.constant 0 : i32
    %c0_i32_0 = arith.constant 0 : i32
    %c0_i32_1 = arith.constant 0 : i32
    return %c0_i32, %c0_i32_0 : i32, i32
  }
  func.func @transform_6(%arg0: i32) -> (i32, i32) {
    %c0_i32 = arith.constant 0 : i32
    %c0_i32_0 = arith.constant 0 : i32
    %c0_i32_1 = arith.constant 0 : i32
    return %c0_i32, %c0_i32_0 : i32, i32
  }
  func.func @transform_7(%arg0: i32) -> (i32, i32) {
    %c0_i32 = arith.constant 0 : i32
    %c0_i32_0 = arith.constant 0 : i32
    %c0_i32_1 = arith.constant 0 : i32
    return %c0_i32, %c0_i32_0 : i32, i32
  }
  func.func @transform_8(%arg0: i32) -> (i32, i32) {
    %c0_i32 = arith.constant 0 : i32
    %c0_i32_0 = arith.constant 0 : i32
    %c0_i32_1 = arith.constant 0 : i32
    return %c0_i32, %c0_i32_0 : i32, i32
  }
  func.func @transform_9(%arg0: i32) -> (i32, i32) {
    %c0_i32 = arith.constant 0 : i32
    %c0_i32_0 = arith.constant 0 : i32
    %c0_i32_1 = arith.constant 0 : i32
    return %c0_i32, %c0_i32_0 : i32, i32
  }
  func.func @transform_10(%arg0: i32) -> (i32, i32) {
    %c0_i32 = arith.constant 0 : i32
    %c0_i32_0 = arith.constant 0 : i32
    %c0_i32_1 = arith.constant 0 : i32
    return %c0_i32, %c0_i32_0 : i32, i32
  }
  func.func @transform_11(%arg0: i32) -> (i32, i32) {
    %c0_i32 = arith.constant 0 : i32
    %c0_i32_0 = arith.constant 0 : i32
    %c0_i32_1 = arith.constant 0 : i32
    return %c0_i32, %c0_i32_0 : i32, i32
  }
  func.func @transform_12(%arg0: i32) -> (i32, i32) {
    %c0_i32 = arith.constant 0 : i32
    %c0_i32_0 = arith.constant 0 : i32
    %c0_i32_1 = arith.constant 0 : i32
    return %c0_i32, %c0_i32_0 : i32, i32
  }
  func.func @transform_13(%arg0: i32) -> (i32, i32) {
    %c0_i32 = arith.constant 0 : i32
    %c0_i32_0 = arith.constant 0 : i32
    %c0_i32_1 = arith.constant 0 : i32
    return %c0_i32, %c0_i32_0 : i32, i32
  }
  func.func @transform_14(%arg0: i32) -> (i32, i32) {
    %c0_i32 = arith.constant 0 : i32
    %c0_i32_0 = arith.constant 0 : i32
    %c0_i32_1 = arith.constant 0 : i32
    return %c0_i32, %c0_i32_0 : i32, i32
  }
  func.func @transform_15(%arg0: i32) -> (i32, i32) {
    %c0_i32 = arith.constant 0 : i32
    %c0_i32_0 = arith.constant 0 : i32
    %c0_i32_1 = arith.constant 0 : i32
    return %c0_i32, %c0_i32_0 : i32, i32
  }
  func.func @transform_16(%arg0: i32) -> (i32, i32) {
    %c0_i32 = arith.constant 0 : i32
    %c0_i32_0 = arith.constant 0 : i32
    %c0_i32_1 = arith.constant 0 : i32
    return %c0_i32, %c0_i32_0 : i32, i32
  }
  func.func @transform_17(%arg0: i32) -> (i32, i32) {
    %c0_i32 = arith.constant 0 : i32
    %c0_i32_0 = arith.constant 0 : i32
    %c0_i32_1 = arith.constant 0 : i32
    return %c0_i32, %c0_i32_0 : i32, i32
  }
  func.func @transform_18(%arg0: i32) -> (i32, i32) {
    %c0_i32 = arith.constant 0 : i32
    %c0_i32_0 = arith.constant 0 : i32
    %c0_i32_1 = arith.constant 0 : i32
    return %c0_i32, %c0_i32_0 : i32, i32
  }
  func.func @transform_19(%arg0: i32) -> (i32, i32) {
    %c0_i32 = arith.constant 0 : i32
    %c0_i32_0 = arith.constant 0 : i32
    %c0_i32_1 = arith.constant 0 : i32
    return %c0_i32, %c0_i32_0 : i32, i32
  }
  func.func @transform_20(%arg0: i32) -> (i32, i32) {
    %c0_i32 = arith.constant 0 : i32
    %c0_i32_0 = arith.constant 0 : i32
    %c0_i32_1 = arith.constant 0 : i32
    return %c0_i32, %c0_i32_0 : i32, i32
  }
  func.func @transform_21(%arg0: i32) -> (i32, i32) {
    %c0_i32 = arith.constant 0 : i32
    %c0_i32_0 = arith.constant 0 : i32
    %c0_i32_1 = arith.constant 0 : i32
    return %c0_i32, %c0_i32_0 : i32, i32
  }
  func.func @transform_22(%arg0: i32) -> (i32, i32, i32) {
    %c0_i32 = arith.constant 0 : i32
    %c0_i32_0 = arith.constant 0 : i32
    %c0_i32_1 = arith.constant 0 : i32
    return %arg0, %c0_i32, %c0_i32_0 : i32, i32, i32
  }
}

</mosaic_0001>

<bundles_post_ra>
// kernel: transformer_decoder_layer_forward.1
= control target key start
LH: loop header
LB: loop body
LE: loop exit
PB: predicated region body
PF: predicated region fallthrough
CT: control target
= control target key end

     0   :  { %s3596_s0 = inlined_call_operand.vmem [shape: f32[2,8,32], index: 0, kind: input, shape index: {}]   ;;  %s3597_s1 = inlined_call_operand.vmem [shape: f32[2,12,32], index: 1, kind: input, shape index: {}]   ;;  %s3598_s2 = inlined_call_operand.vmem [shape: f32[2,8,32], index: 2, kind: input, shape index: {}]   ;;  %s3599_s3 = inlined_call_operand.vmem [shape: f32[2,12,32], index: 3, kind: input, shape index: {}]   ;;  %s3600_s4 = inlined_call_operand.vmem [shape: bf16[32,96], index: 4, kind: input, shape index: {}]   ;;  %s3601_s5 = inlined_call_operand.vmem [shape: f32[1,96], index: 5, kind: input, shape index: {}]   ;;  %s3602_s6 = inlined_call_operand.vmem [shape: bf16[32,32], index: 6, kind: input, shape index: {}]   ;;  %s3603_s7 = inlined_call_operand.vmem [shape: f32[1,32], index: 7, kind: input, shape index: {}]   ;;  %s3604_s8 = inlined_call_operand.vmem [shape: bf16[32,96], index: 8, kind: input, shape index: {}]   ;;  %s3605_s9 = inlined_call_operand.vmem [shape: f32[1,96], index: 9, kind: input, shape index: {}]   ;;  %s3606_s10 = inlined_call_operand.vmem [shape: bf16[32,32], index: 10, kind: input, shape index: {}]   ;;  %s3607_s11 = inlined_call_operand.vmem [shape: f32[1,32], index: 11, kind: input, shape index: {}]   ;;  %s3608_s12 = inlined_call_operand.vmem [shape: bf16[32,64], index: 12, kind: input, shape index: {}]   ;;  %s3609_s13 = inlined_call_operand.vmem [shape: f32[1,64], index: 13, kind: input, shape index: {}]   ;;  %s3610_s14 = inlined_call_operand.vmem [shape: bf16[64,32], index: 14, kind: input, shape index: {}]   ;;  %s3611_s15 = inlined_call_operand.vmem [shape: f32[1,32], index: 15, kind: input, shape index: {}]   ;;  %s3612_s16 = inlined_call_operand.vmem [shape: f32[1,32], index: 16, kind: input, shape index: {}]   ;;  %s3613_s17 = inlined_call_operand.vmem [shape: f32[1,32], index: 17, kind: input, shape index: {}]   ;;  %s3614_s18 = inlined_call_operand.vmem [shape: f32[1,32], index: 18, kind: input, shape index: {}]   ;;  %s3615_s19 = inlined_call_operand.vmem [shape: f32[1,32], index: 19, kind: input, shape index: {}]   ;;  %s3616_s20 = inlined_call_operand.vmem [shape: f32[1,32], index: 20, kind: input, shape index: {}]   ;;  %s3617_s21 = inlined_call_operand.vmem [shape: f32[1,32], index: 21, kind: input, shape index: {}]   ;;  %s3618_s22 = inlined_call_operand.vmem [shape: f32[2,8,32], index: 22, kind: output, shape index: {}]  }
   0x1   :  { %3632 = sst [smem:[#allocation3_spill]] %s3596_s0 }
   0x2   :  { %3633 = sst [smem:[#allocation4_spill]] %s3597_s1 }
   0x3   :  { %3634 = sst [smem:[#allocation5_spill]] %s3598_s2 }
   0x4   :  { %3635 = sst [smem:[#allocation6_spill]] %s3599_s3  ;;  %s3254_s3 = smov 0  }
   0x5   :  { %3636 = sst [smem:[#allocation7_spill]] %s3600_s4 }
   0x6   :  { %3637 = sst [smem:[#allocation8_spill]] %s3601_s5 }
   0x7   :  { %3638 = sst [smem:[#allocation9_spill]] %s3602_s6 }
   0x8 LB: > { %s2714_s28 = sadd.s32 4294967295, %s3124_s3   ;;  %p2718_p0 = scmp.ge.s32.totalorder %s3124_s3, 1  ;;  %s3124_s3 = sphi %s3254_s3, %s32_s3  }
   0x9   : > { %p640_p1 = scmp.lt.s32.totalorder %s3124_s3, 3 }
   0xb   : > { %p641_p2 = pnand %p2718_p0, %p640_p1 }
   0xc   : > { %s3639_s4 = sld [smem:[#allocation7_spill]] (!%p641_p2)  ;;  %p714_p3 = scmp.lt.s32.totalorder (!%p641_p2), %s2714_s28, 1 }
   0xd   : > { %644 = sbr.rel (%p641_p2) target bundleno = 4268 (0x10ac), region = 108  ;;  %s3640_s6 = sld [smem:[#allocation3_spill]] (!%p641_p2) }
   0xe   : > { %s3641_s27 = sld [smem:[#allocation5_spill]] (!%p641_p2)  ;;  %s3128_s5 = smov (!%p641_p2), 80  }
   0xf   : > { %s3642_s23 = sld [smem:[#allocation8_spill]] (!%p641_p2)  ;;  %s3129_s24 = smov (!%p641_p2), 96  }
  0x10   : > { %s3628_s26 = smov (!%p641_p2), 112   ;;  %s3630_s2 = smov (!%p641_p2), 120  }
  0x11   : > { %s3625_s30 = smov (!%p641_p2), 8  }
  0x12   : > { %v3066_v0 = vld [vmem:[%s3639_s4 + $0x8] sm:$0xff]   ;;  %v3126_v1 = vmov 0.0   ;;  %v3067_v2 = vld [vmem:[%s3639_s4] sm:$0xff]   ;;  %vm3127_vm0 = vmmov 0   ;;  %s3654_s28 = smov (!%p714_p3, %s2714_s28), 1  ;;  %vm773_vm1 = vcmask 261120  }
  0x13   : > { %2842 = vmatprep.subr.bf16.mxu1 %v3126_v1  ;;  %2858 = vmatprep.subr.bf16.mxu0 %v3126_v1  ;;  %s3278_s1 = sshll.u32 %s3654_s28, 3  ;;  %vm918_vm2 = vcmask 1043456   ;;  %vm914_vm3 = vcmask 64512   ;;  %vm1172_vm4 = vcmask 130112   ;;  %vm1322_vm5 = vcmask 195712   ;;  %s2779_s0 = sshll.u32 %s3654_s28, 4 }
  0x14   : > { %2843 = vmatpush3.bf16.msra.mxu1 %v3066_v0  ;;  %2846 = vmatprep.mubr.msk.bf16.mxu1 %vm3127_vm0, %v3126_v1  ;;  %s717_s25 = scalar_lea.vmem %s3640_s6, %s3278_s1  ;;  %s726_s29 = scalar_lea.vmem %s3641_s27, %s3278_s1  ;;  %vm1472_vm6 = vcmask 261312   ;;  %vm1827_vm7 = vcmask 97280   ;;  %vm1844_vm8 = vcmask 1045504   ;;  %vm2550_vm9 = vcmask 523264  }
  0x15   : > { %2844 = vmatprep.subr.bf16.mxu1 %v3126_v1  ;;  %2860 = vmatprep.mubr.msk.bf16.mxu0 %vm3127_vm0, %v3126_v1  ;;  %v3289_v3 = vld [vmem:[%s717_s25] sm:$0xff]  ;;  %s3130_s6 = smov 72   ;;  %s3131_s25 = smov 88  }
  0x16   : > { %v3291_v4 = vld [vmem:[%s726_s29] sm:$0xff]  ;;  %s3626_s27 = smov 104   ;;  %s3621_s29 = smov 64   ;;  %v817_v38 = vpack.c.bf16 %v3289_v3, %v3289_v3 }
  0x17   : > { %v753_v5 = vadd.f32 %v3291_v4, %v3289_v3  ;;  %v3301_v7 = vld [vmem:[%s3642_s23] ss:$0 sm:$0xff]  ;;  %s3649_s28 = smov 64  }
  0x18   : > { %2845 = vmatpush3.bf16.msra.mxu1 %v3067_v2 }
  0x19   : > { %2850 = vmatprep.subr.bf16.mxu1 %v3126_v1  ;;  %v754_v6 = vpack.c.bf16 %v753_v5, %v753_v5 }
  0x1b   : > { %2847 = vmatmul.mubr.msk.bf16.vlgmr.msra.gmra.mxu1 %vm773_vm1, %v754_v6 }
  0x1c   : > { %2854 = vmatprep.mubr.msk.bf16.mxu1 %vm3127_vm0, %v3126_v1 }
  0xdb   : > { %v811_v8 = vpop.f32.mrf.mxu1 }
  0xdc   : > { %v812_v9 = vadd.f32 %v3301_v7, %v811_v8 }
  0xdd   : > { %v2848_v10 = vpop.f32.mrf.mxu1 }
  0xde   : > { %1174 = vrot.lane.b32.xlu1 %v812_v9, %s3128_s5  ;;  %878 = vrot.lane.b32.xlu0 %v812_v9, %s3129_s24  ;;  %v875_v12 = vmul.f32 0.35355338, %v812_v9  ;;  %s3643_s5 = sld [smem:[#allocation9_spill]] }
  0xdf   : > { %v814_v11 = vpop.f32.mrf.mxu1 }
  0xe0   : > { %v876_v14 = vpack.c.bf16 %v875_v12, %v875_v12 }
  0xe1   : > { %v2849_v13 = vpop.f32.mrf.mxu1 }
  0xe2   : > { %1324 = vrot.lane.b32.xlu1 %v812_v9, %s3130_s6  ;;  %1022 = vrot.lane.b32.xlu0 %v812_v9, %s3131_s25  ;;  %s3644_s25 = sld [smem:[#allocation4_spill]] }
  0xe6   : > { %1210 = vrot.lane.b32.xlu1 %v876_v14, %s3628_s26  ;;  %1059 = vrot.lane.b32.xlu0 %v876_v14, %s3630_s2 }
  0xea   : > { %1360 = vrot.lane.b32.xlu1 %v876_v14, %s3626_s27 }
 0x150   : > { %v1175_v15 = vpop.permute.xlu1 %1174  ;;  %v879_v16 = vpop.permute.xlu0 %878 }
 0x151   : > { %1177 = vxpose.xlu1.b32.start.end [1/1] (short) (narrow) %v1175_v15, 8 }
 0x154   : > { %v1023_v17 = vpop.permute.xlu0 %1022  ;;  %v1325_v19 = vpop.permute.xlu1 %1324 }
 0x155   : > { %v3035_v18 = vpack.i.bf16 %v1023_v17, %v879_v16 }
 0x157   : > { %3036 = vxpose.xlu0.b32.start.end [1/1] (short) (narrow) %v3035_v18, 8 }
 0x158   : > { %v1060_v20 = vpop.permute.xlu0 %1059  ;;  %v1211_v21 = vpop.permute.xlu1 %1210 }
 0x15b   : > { %1327 = vxpose.xlu0.b32.start.end [1/1] (short) (narrow) %v1325_v19, 8 }
 0x15c   : > { %v1361_v26 = vpop.permute.xlu1 %1360 }
 0x16f   : > { %818 = vrot.lane.b32.xlu1 %v3067_v2, %s3621_s29 }
 0x184   : > { %820 = vrot.lane.b32.xlu0 %v3066_v0, %s3621_s29 }
 0x1cd   : > { %v1193_v29 = vpop.trf.xlu1 }
 0x1ce   : > { %v1209_v31 = vpack.c.bf16 %v1193_v29, %v1193_v29 }
 0x1d0   : > { %v1216_v32 = vsel %vm918_vm2, %v1209_v31, 0 }
 0x1d3   : > { %v3037_v22 = vpop.trf.xlu0 }
 0x1d4   : > { %v3041_v23 = vunpack.i.h.bf16 %v3037_v22  ;;  %v3038_v24 = vunpack.i.l.bf16 %v3037_v22 }
 0x1d6   : > { %v913_v25 = vpack.c.bf16 %v3038_v24, %v3038_v24  ;;  %v1057_v28 = vpack.c.bf16 %v3041_v23, %v3041_v23 }
 0x1d7   : > { %v1343_v33 = vpop.trf.xlu0 }
 0x1d8   : > { %v920_v27 = vsel %vm918_vm2, %v913_v25, 0  ;;  %v1065_v30 = vsel %vm918_vm2, %v1057_v28, 0  ;;  %v1359_v34 = vpack.c.bf16 %v1343_v33, %v1343_v33 }
 0x1d9   : > { %2859 = vmatpush3.bf16.msra.mxu0 %v920_v27 }
 0x1da   : > { %2870 = vmatprep.subr.bf16.mxu0 %v3126_v1  ;;  %v1366_v35 = vsel %vm918_vm2, %v1359_v34, 0 }
 0x1dc   : > { %2861 = vmatmul.mubr.msk.bf16.vlgmr.msra.gmra.mxu0 %vm914_vm3, %v876_v14 }
 0x1dd   : > { %2871 = vmatpush3.bf16.msra.mxu0 %v1065_v30  ;;  %2872 = vmatprep.mubr.msk.bf16.mxu0 %vm3127_vm0, %v3126_v1 }
 0x1de   : > { %2882 = vmatprep.subr.bf16.mxu0 %v3126_v1 }
 0x1e1   : > { %v819_v37 = vpop.permute.xlu1 %818 }
 0x1e4   : > { %2873 = vmatmul.mubr.msk.bf16.vlgmr.msra.gmra.mxu0 %vm914_vm3, %v1060_v20 }
 0x1e5   : > { %2883 = vmatpush3.bf16.msra.mxu0 %v1216_v32  ;;  %2884 = vmatprep.mubr.msk.bf16.mxu0 %vm3127_vm0, %v3126_v1 }
 0x1e6   : > { %2894 = vmatprep.subr.bf16.mxu0 %v3126_v1 }
 0x1ec   : > { %2885 = vmatmul.mubr.msk.bf16.vlgmr.msra.gmra.mxu0 %vm914_vm3, %v1211_v21 }
 0x1ed   : > { %2895 = vmatpush3.bf16.msra.mxu0 %v1366_v35  ;;  %2896 = vmatprep.mubr.msk.bf16.mxu0 %vm3127_vm0, %v3126_v1 }
 0x1ee   : > { %2906 = vmatprep.subr.bf16.mxu0 %v3126_v1 }
 0x1f4   : > { %2897 = vmatmul.mubr.msk.bf16.vlgmr.msra.gmra.mxu0 %vm914_vm3, %v1361_v26 }
 0x1f5   : > { %2910 = vmatprep.mubr.msk.bf16.mxu0 %vm3127_vm0, %v3126_v1 }
 0x1f6   : > { %v821_v36 = vpop.permute.xlu0 %820 }
 0x1f7   : > { %2851 = vmatpush3.bf16.msra.mxu1 %v821_v36 }
 0x1f8   : > { %2852 = vmatprep.subr.bf16.mxu1 %v3126_v1 }
 0x1fb   : > { %2853 = vmatpush3.bf16.msra.mxu1 %v819_v37 }
 0x1fc   : > { %2864 = vmatprep.subr.bf16.mxu1 %v3126_v1 }
 0x1fe   : > { %2855 = vmatmul.mubr.msk.bf16.vlgmr.msra.gmra.mxu1 %vm773_vm1, %v817_v38 }
 0x1ff   : > { %2866 = vmatprep.mubr.msk.bf16.mxu1 %vm3127_vm0, %v3126_v1 }
 0x29c   : > { %v956_v39 = vpop.f32.mrf.mxu0 }
 0x29d   : > { %v962_v40 = vsel %vm914_vm3, %v956_v39, -inf }
 0x29e   : > { %963 = vmax.xlane.f32.xlu0 %v962_v40  ;;  %v2862_v41 = vpop.f32.mrf.mxu0 }
 0x2a0   : > { %v959_v42 = vpop.f32.mrf.mxu0 }
 0x2a2   : > { %v2863_v43 = vpop.f32.mrf.mxu0 }
 0x2a4   : > { %v1101_v44 = vpop.f32.mrf.mxu0 }
 0x2a5   : > { %v1107_v45 = vsel %vm914_vm3, %v1101_v44, -inf }
 0x2a6   : > { %1108 = vmax.xlane.f32.xlu1 %v1107_v45  ;;  %v2874_v46 = vpop.f32.mrf.mxu0 }
 0x2a8   : > { %v1104_v47 = vpop.f32.mrf.mxu0 }
 0x2aa   : > { %v2875_v48 = vpop.f32.mrf.mxu0 }
 0x2ac   : > { %v1252_v49 = vpop.f32.mrf.mxu0 }
 0x2ad   : > { %v1258_v50 = vsel %vm914_vm3, %v1252_v49, -inf }
 0x2ae   : > { %1259 = vmax.xlane.f32.xlu0 %v1258_v50  ;;  %v2886_v51 = vpop.f32.mrf.mxu0 }
 0x2b0   : > { %v1255_v52 = vpop.f32.mrf.mxu0 }
 0x2b2   : > { %v2887_v53 = vpop.f32.mrf.mxu0 }
 0x2b4   : > { %v1402_v54 = vpop.f32.mrf.mxu0 }
 0x2b5   : > { %v1408_v55 = vsel %vm914_vm3, %v1402_v54, -inf }
 0x2b6   : > { %1409 = vmax.xlane.f32.xlu0 %v1408_v55  ;;  %v2898_v56 = vpop.f32.mrf.mxu0  ;;  %v3068_v55 = vld [vmem:[%s3643_s5 + $0x8] sm:$0xff]  }
 0x2b7   : > { %824 = vrot.lane.b32.xlu1 %v3301_v7, %s3621_s29  ;;  %2907 = vmatpush3.bf16.msra.mxu0 %v3068_v55  ;;  %s3623_s29 = smov 16  }
 0x2b8   : > { %v1405_v57 = vpop.f32.mrf.mxu0  ;;  %2908 = vmatprep.subr.bf16.mxu0 %v3126_v1 }
 0x2b9   : > { %v3069_v57 = vld [vmem:[%s3643_s5] sm:$0xff]  }
 0x2ba   : > { %v2899_v58 = vpop.f32.mrf.mxu0 }
 0x2bb   : > { %2909 = vmatpush3.bf16.msra.mxu0 %v3069_v57 }
 0x2bc   : > { %2922 = vmatprep.subr.bf16.mxu0 %v3126_v1 }
 0x2be   : > { %v864_v59 = vpop.f32.mrf.mxu1 }
 0x2c0   : > { %v2856_v60 = vpop.f32.mrf.mxu1 }
 0x2c2   : > { %v867_v61 = vpop.f32.mrf.mxu1 }
 0x2c4   : > { %v2857_v62 = vpop.f32.mrf.mxu1 }
 0x2c5   : > { %v3384_v62 = vld [vmem:[%s3604_s8 + $0x8] sm:$0xff]  }
 0x327   : > { %v964_v63 = vpop.xlane.xlu0 %963 }
 0x328   : > { %v965_v0 = vsub.f32 %v956_v39, %v964_v63 }
 0x32a   : > { %v966_v2 = vmul.f32 1.442695, %v965_v0  ;;  %v3391_v0 = vld [vmem:[%s3604_s8] sm:$0xff]  }
 0x32c   : > { %3080 = vpow2.f32 %v966_v2 }
 0x32f   : > { %v1109_v5 = vpop.xlane.xlu1 %1108 }
 0x330   : > { %v1110_v6 = vsub.f32 %v1101_v44, %v1109_v5 }
 0x332   : > { %v1111_v8 = vmul.f32 1.442695, %v1110_v6 }
 0x333   : > { %v825_v9 = vpop.permute.xlu1 %824 }
 0x334   : > { %3082 = vpow2.f32 %v1111_v8  ;;  %v865_v10 = vadd.f32 %v864_v59, %v825_v9 }
 0x336   : > { %v974_v11 = vpack.c.bf16 %v865_v10, %v865_v10 }
 0x337   : > { %v1260_v12 = vpop.xlane.xlu0 %1259 }
 0x338   : > { %v1261_v13 = vsub.f32 %v1252_v49, %v1260_v12  ;;  %1120 = vrot.lane.b32.xlu1 %v974_v11, %s3630_s2  ;;  %v979_v7 = vsel %vm918_vm2, %v974_v11, 0 }
 0x339   : > { %v3081_v14 = vpop.eup %3080  ;;  %2865 = vmatpush3.bf16.msra.mxu1 %v979_v7 }
 0x33a   : > { %v1262_v15 = vmul.f32 1.442695, %v1261_v13  ;;  %v968_v16 = vsel %vm914_vm3, %v3081_v14, 0.0  ;;  %2876 = vmatprep.subr.bf16.mxu1 %v3126_v1 }
 0x33b   : > { %969 = vadd.xlane.f32.xlu0 %v968_v16 }
 0x33c   : > { %3084 = vpow2.f32 %v1262_v15  ;;  %1420 = vrot.lane.b32.xlu1 %v974_v11, %s3626_s27  ;;  %s735_s27 = scalar_lea.vmem %s3618_s22, %s3278_s1 }
 0x33f   : > { %v1410_v17 = vpop.xlane.xlu0 %1409 }
 0x340   : > { %v1411_v18 = vsub.f32 %v1402_v54, %v1410_v17 }
 0x341   : > { %v3083_v19 = vpop.eup %3082 }
 0x342   : > { %v1412_v20 = vmul.f32 1.442695, %v1411_v18  ;;  %v1113_v21 = vsel %vm914_vm3, %v3083_v19, 0.0 }
 0x343   : > { %1114 = vadd.xlane.f32.xlu0 %v1113_v21  ;;  %v2739_v21 = vld [vmem:[%s3603_s7] ss:$0 sm:$0xff] }
 0x344   : > { %3086 = vpow2.f32 %v1412_v20 }
 0x349   : > { %v3085_v22 = vpop.eup %3084 }
 0x34a   : > { %v1264_v23 = vsel %vm914_vm3, %v3085_v22, 0.0 }
 0x34b   : > { %1265 = vadd.xlane.f32.xlu0 %v1264_v23 }
 0x351   : > { %v3087_v24 = vpop.eup %3086 }
 0x352   : > { %v1414_v25 = vsel %vm914_vm3, %v3087_v24, 0.0 }
 0x353   : > { %1415 = vadd.xlane.f32.xlu0 %v1414_v25 }
 0x369   : > { %1270 = vrot.lane.b32.xlu0 %v974_v11, %s3628_s26  ;;  %s3645_s26 = sld [smem:[#allocation6_spill]] }
 0x36d   : > { %1636 = vrot.lane.b32.xlu0 %v3384_v62, %s3129_s24 }
 0x36f   : > { %s731_s2 = scalar_lea.vmem %s3645_s26, %s2779_s0  ;;  %s3650_s26 = smov 8  }
 0x370   : > { %v741_v15 = vld [vmem:[%s731_s2] sm:$0xff]  ;;  %v742_v16 = vld [vmem:[%s731_s2 + $0x8] sm:$0xf] }
 0x371   : > { %1634 = vrot.lane.b32.xlu0 %v3391_v0, %s3129_s24 }
 0x3aa   : > { %v1121_v31 = vpop.permute.xlu1 %1120 }
 0x3ab   : > { %v1126_v32 = vsel %vm918_vm2, %v1121_v31, 0 }
 0x3ae   : > { %v1421_v42 = vpop.permute.xlu1 %1420 }
 0x3af   : > { %v1426_v44 = vsel %vm918_vm2, %v1421_v42, 0 }
 0x3c4   : > { %v970_v26 = vpop.xlane.xlu0 %969 }
 0x3c5   : > { %3088 = vrcp.f32 %v970_v26 }
 0x3cc   : > { %v1115_v27 = vpop.xlane.xlu0 %1114 }
 0x3cd   : > { %3090 = vrcp.f32 %v1115_v27 }
 0x3d2   : > { %v3089_v28 = vpop.eup %3088 }
 0x3d3   : > { %v972_v29 = vmul.f32 %v3089_v28, %v3081_v14 }
 0x3d4   : > { %v1266_v30 = vpop.xlane.xlu0 %1265 }
 0x3d5   : > { %3092 = vrcp.f32 %v1266_v30  ;;  %v973_v33 = vpack.c.bf16 %v972_v29, %v972_v29  ;;  %v3432_v29 = vld [vmem:[%s3605_s9] ss:$0 sm:$0xff] }
 0x3d7   : > { %2867 = vmatmul.mubr.msk.bf16.vlgmr.msra.gmra.mxu1 %vm914_vm3, %v973_v33 }
 0x3d8   : > { %2877 = vmatpush3.bf16.msra.mxu1 %v1126_v32  ;;  %2878 = vmatprep.mubr.msk.bf16.mxu1 %vm3127_vm0, %v3126_v1 }
 0x3d9   : > { %2888 = vmatprep.subr.bf16.mxu1 %v3126_v1 }
 0x3da   : > { %v3091_v34 = vpop.eup %3090 }
 0x3db   : > { %v1117_v35 = vmul.f32 %v3091_v34, %v3083_v19 }
 0x3dc   : > { %v1416_v36 = vpop.xlane.xlu0 %1415 }
 0x3dd   : > { %3094 = vrcp.f32 %v1416_v36  ;;  %v1118_v37 = vpack.c.bf16 %v1117_v35, %v1117_v35 }
 0x3df   : > { %2879 = vmatmul.mubr.msk.bf16.vlgmr.msra.gmra.mxu1 %vm914_vm3, %v1118_v37 }
 0x3e0   : > { %v1271_v38 = vpop.permute.xlu0 %1270  ;;  %2890 = vmatprep.mubr.msk.bf16.mxu1 %vm3127_vm0, %v3126_v1 }
 0x3e1   : > { %v1276_v39 = vsel %vm918_vm2, %v1271_v38, 0 }
 0x3e2   : > { %v3093_v40 = vpop.eup %3092  ;;  %2889 = vmatpush3.bf16.msra.mxu1 %v1276_v39 }
 0x3e3   : > { %2900 = vmatprep.subr.bf16.mxu1 %v3126_v1  ;;  %v1268_v41 = vmul.f32 %v3093_v40, %v3085_v22 }
 0x3e4   : > { %v1637_v13 = vpop.permute.xlu0 %1636 }
 0x3e5   : > { %v1269_v43 = vpack.c.bf16 %v1268_v41, %v1268_v41 }
 0x3e7   : > { %2891 = vmatmul.mubr.msk.bf16.vlgmr.msra.gmra.mxu1 %vm914_vm3, %v1269_v43 }
 0x3e8   : > { %2901 = vmatpush3.bf16.msra.mxu1 %v1426_v44  ;;  %2902 = vmatprep.mubr.msk.bf16.mxu1 %vm3127_vm0, %v3126_v1  ;;  %v1635_v19 = vpop.permute.xlu0 %1634 }
 0x3e9   : > { %2914 = vmatprep.subr.bf16.mxu1 %v3126_v1 }
 0x3ea   : > { %v3095_v45 = vpop.eup %3094 }
 0x3eb   : > { %v1418_v46 = vmul.f32 %v3095_v45, %v3087_v24 }
 0x3ed   : > { %v1419_v47 = vpack.c.bf16 %v1418_v46, %v1418_v46 }
 0x3ef   : > { %2903 = vmatmul.mubr.msk.bf16.vlgmr.msra.gmra.mxu1 %vm914_vm3, %v1419_v47  ;;  %v2743_v47 = vld [vmem:[%s3612_s16] ss:$0 sm:$0xff] }
 0x3f0   : > { %2918 = vmatprep.mubr.msk.bf16.mxu1 %vm3127_vm0, %v3126_v1  ;;  %2915 = vmatpush3.bf16.msra.mxu1 %v3384_v62 }
 0x3f1   : > { %2916 = vmatprep.subr.bf16.mxu1 %v3126_v1 }
 0x3f4   : > { %2917 = vmatpush3.bf16.msra.mxu1 %v3391_v0 }
 0x3f5   : > { %2930 = vmatprep.subr.bf16.mxu1 %v3126_v1 }
 0x497   : > { %v1015_v48 = vpop.f32.mrf.mxu1 }
 0x498   : > { %1021 = vst.msk [vmem:[#allocation2] sm:$0xff] %vm914_vm3, %v1015_v48 }
 0x499   : > { %v2868_v49 = vpop.f32.mrf.mxu1 }
 0x49b   : > { %v1018_v50 = vpop.f32.mrf.mxu1 }
 0x49c   : > { %v2744_v50 = vld [vmem:[%s3613_s17] ss:$0 sm:$0xff] }
 0x49d   : > { %v2869_v51 = vpop.f32.mrf.mxu1 }
 0x49f   : > { %v1162_v52 = vpop.f32.mrf.mxu1 }
 0x4a0   : > { %1169 = vrot.lane.b32.xlu1 %v1162_v52, %s3625_s30  ;;  %s3647_s30 = smov 112  }
 0x4a1   : > { %v2880_v53 = vpop.f32.mrf.mxu1 }
 0x4a3   : > { %v1165_v54 = vpop.f32.mrf.mxu1 }
 0x4a5   : > { %v2881_v56 = vpop.f32.mrf.mxu1 }
 0x4a7   : > { %v1312_v58 = vpop.f32.mrf.mxu1 }
 0x4a8   : > { %1319 = vrot.lane.b32.xlu1 %v1312_v58, %s3623_s29  ;;  %s3624_s29 = smov 24  }
 0x4a9   : > { %v2892_v59 = vpop.f32.mrf.mxu1 }
 0x4ab   : > { %v1315_v60 = vpop.f32.mrf.mxu1 }
 0x4ad   : > { %v2893_v61 = vpop.f32.mrf.mxu1 }
 0x4af   : > { %v1462_v63 = vpop.f32.mrf.mxu1 }
 0x4b0   : > { %1469 = vrot.lane.b32.xlu1 %v1462_v63, %s3624_s29  ;;  %s722_s29 = scalar_lea.vmem %s3644_s25, %s2779_s0  ;;  %s3652_s0 = smov 24  }
 0x4b1   : > { %v2904_v2 = vpop.f32.mrf.mxu1  ;;  %v3413_v7 = vld [vmem:[%s722_s29] sm:$0xff]  ;;  %v3415_v14 = vld [vmem:[%s722_s29 + $0x8] sm:$0xf]  ;;  %s3646_s29 = smov 120  }
 0x4b2   : > { %v1631_v17 = vadd.f32 %v741_v15, %v3413_v7  ;;  %v1632_v18 = vadd.f32 %v742_v16, %v3415_v14 }
 0x4b3   : > { %v1465_v5 = vpop.f32.mrf.mxu1 }
 0x4b4   : > { %v1633_v20 = vpack.c.bf16 %v1632_v18, %v1631_v17 }
 0x4b5   : > { %v2905_v6 = vpop.f32.mrf.mxu1 }
 0x512   : > { %v1170_v8 = vpop.permute.xlu1 %1169 }
 0x513   : > { %1173 = vst.msk [vmem:[#allocation2] sm:$0xff] %vm1172_vm4, %v1170_v8 }
 0x51a   : > { %v1320_v9 = vpop.permute.xlu1 %1319 }
 0x51b   : > { %1323 = vst.msk [vmem:[#allocation2] sm:$0xff] %vm1322_vm5, %v1320_v9 }
 0x522   : > { %v1470_v10 = vpop.permute.xlu1 %1469 }
 0x523   : > { %1473 = vst.msk [vmem:[#allocation2] sm:$0xff] %vm1472_vm6, %v1470_v10 }
 0x52a   : > { %v1474_v11 = vld [vmem:[#allocation2] sm:$0xff] }
 0x52b   : > { %v1475_v12 = vpack.c.bf16 %v1474_v11, %v1474_v11 }
 0x52d   : > { %2911 = vmatmul.mubr.msk.bf16.vlgmr.msra.gmra.mxu0 %vm773_vm1, %v1475_v12 }
 0x52e   : > { %2926 = vmatprep.mubr.msk.bf16.mxu0 %vm3127_vm0, %v3126_v1  ;;  %2923 = vmatpush3.bf16.msra.mxu0 %v1637_v13 }
 0x52f   : > { %2924 = vmatprep.subr.bf16.mxu0 %v3126_v1 }
 0x532   : > { %2925 = vmatpush3.bf16.msra.mxu0 %v1635_v19 }
 0x533   : > { %2938 = vmatprep.subr.bf16.mxu0 %v3126_v1 }
 0x535   : > { %2927 = vmatmul.mubr.msk.bf16.vlgmr.msra.gmra.mxu0 %vm773_vm1, %v1633_v20 }
 0x536   : > { %2940 = vmatprep.mubr.msk.bf16.mxu0 %vm3127_vm0, %v3126_v1 }
 0x5ed   : > { %v1531_v22 = vpop.f32.mrf.mxu0 }
 0x5ee   : > { %v1532_v23 = vadd.f32 %v2739_v21, %v1531_v22 }
 0x5ef   : > { %v2912_v24 = vpop.f32.mrf.mxu0 }
 0x5f0   : > { %v1537_v25 = vadd.f32 %v1532_v23, %v3289_v3 }
 0x5f1   : > { %v1534_v26 = vpop.f32.mrf.mxu0 }
 0x5f2   : > { %v1540_v27 = vsel %vm773_vm1, %v1537_v25, 0.0 }
 0x5f3   : > { %1541 = vadd.xlane.f32.xlu1 %v1540_v27  ;;  %v2913_v28 = vpop.f32.mrf.mxu0 }
 0x5f5   : > { %v1680_v30 = vpop.f32.mrf.mxu0 }
 0x5f7   : > { %v2928_v31 = vpop.f32.mrf.mxu0 }
 0x5f9   : > { %v1683_v32 = vpop.f32.mrf.mxu0 }
 0x5fb   : > { %v2929_v33 = vpop.f32.mrf.mxu0 }
 0x604   : > { %1640 = vrot.lane.b32.xlu1 %v3432_v29, %s3129_s24  ;;  %s3648_s24 = smov 104  }
 0x67c   : > { %v1542_v34 = vpop.xlane.xlu1 %1541 }
 0x67d   : > { %v1544_v35 = vmul.f32 0.03125, %v1542_v34 }
 0x67f   : > { %v1545_v3 = vsub.f32 %v1537_v25, %v1544_v35 }
 0x680   : > { %v1641_v38 = vpop.permute.xlu1 %1640 }
 0x681   : > { %v1546_v36 = vmul.f32 %v1545_v3, %v1545_v3  ;;  %v1681_v39 = vadd.f32 %v1680_v30, %v1641_v38  ;;  %v1684_v40 = vadd.f32 %v1683_v32, %v1641_v38  ;;  %v1687_v30 = vpack.c.bf16 %v3415_v14, %v3413_v7 }
 0x683   : > { %v1547_v37 = vsel %vm773_vm1, %v1546_v36, 0.0  ;;  %v3042_v41 = vpack.i.bf16 %v1684_v40, %v1681_v39 }
 0x684   : > { %1548 = vadd.xlane.f32.xlu0 %v1547_v37 }
 0x685   : > { %3048 = vrot.lane.b32.xlu1 %v3042_v41, %s3647_s30 }
 0x689   : > { %3053 = vrot.lane.b32.xlu1 %v3042_v41, %s3648_s24 }
 0x69a   : > { %3043 = vrot.lane.b32.xlu0 %v3042_v41, %s3646_s29 }
 0x6f7   : > { %v3049_v45 = vpop.permute.xlu1 %3048 }
 0x6f8   : > { %v3050_v48 = vunpack.i.l.bf16 %v3049_v45  ;;  %v3051_v51 = vunpack.i.h.bf16 %v3049_v45 }
 0x6fa   : > { %2051 = vxpose.xlu0.b32.start [1/2] (short) (narrow) %v3050_v48, 8 }
 0x6fe   : > { %2052 = vxpose.xlu0.b32.end [2/2] (short) (narrow) %v3051_v51, 8 }
 0x70d   : > { %v1549_v42 = vpop.xlane.xlu0 %1548 }
 0x70e   : > { %v1550_v43 = vmul.f32 0.03125, %v1549_v42 }
 0x710   : > { %v1551_v44 = vadd.f32 1e-05, %v1550_v43 }
 0x711   : > { %v3044_v2 = vpop.permute.xlu0 %3043 }
 0x712   : > { %3096 = vrsqrt.f32 %v1551_v44  ;;  %v3045_v6 = vunpack.i.l.bf16 %v3044_v2  ;;  %v3046_v9 = vunpack.i.h.bf16 %v3044_v2 }
 0x714   : > { %v3057_v10 = vpack.i.bf16 %v3045_v6, %v1681_v39  ;;  %v3059_v11 = vpack.i.bf16 %v3046_v9, %v1684_v40 }
 0x71f   : > { %v3097_v46 = vpop.eup %3096 }
 0x720   : > { %v1553_v49 = vmul.f32 %v3097_v46, %v1545_v3 }
 0x722   : > { %v1560_v52 = vmul.f32 %v2743_v47, %v1553_v49 }
 0x724   : > { %v3446_v53 = vadd.f32 %v2744_v50, %v1560_v52 }
 0x726   : > { %v1568_v54 = vadd.f32 %v3446_v53, %v3291_v4  ;;  %v3054_v4 = vpop.permute.xlu1 %3053 }
 0x727   : > { %v3055_v5 = vunpack.i.l.bf16 %v3054_v4  ;;  %v3056_v8 = vunpack.i.h.bf16 %v3054_v4 }
 0x728   : > { %v1569_v55 = vpack.c.bf16 %v1568_v54, %v1568_v54 }
 0x72a   : > { %2919 = vmatmul.mubr.msk.bf16.vlgmr.msra.gmra.mxu1 %vm773_vm1, %v1569_v55 }
 0x72b   : > { %2934 = vmatprep.mubr.msk.bf16.mxu1 %vm3127_vm0, %v3126_v1 }
 0x776   : > { %v2067_v13 = vpop.trf.xlu0 }
 0x7ea   : > { %v1625_v56 = vpop.f32.mrf.mxu1 }
 0x7eb   : > { %v1626_v57 = vadd.f32 %v3432_v29, %v1625_v56 }
 0x7ec   : > { %v2920_v58 = vpop.f32.mrf.mxu1 }
 0x7ed   : > { %v1746_v59 = vmul.f32 0.35355338, %v1626_v57 }
 0x7ee   : > { %v1628_v60 = vpop.f32.mrf.mxu1 }
 0x7ef   : > { %v1747_v61 = vpack.c.bf16 %v1746_v59, %v1746_v59 }
 0x7f0   : > { %v2921_v63 = vpop.f32.mrf.mxu1 }
 0x7f1   : > { %2084 = vrot.lane.b32.xlu0 %v1747_v61, %s3647_s30  ;;  %1931 = vrot.lane.b32.xlu1 %v1747_v61, %s3646_s29 }
 0x7f5   : > { %2236 = vrot.lane.b32.xlu0 %v1747_v61, %s3648_s24 }
 0x813   : > { %2203 = vxpose.xlu0.b32.start [1/2] (short) (narrow) %v3055_v5, 8 }
 0x817   : > { %2204 = vxpose.xlu0.b32.end [2/2] (short) (narrow) %v3056_v8, 8 }
 0x81a   : > { %3058 = vxpose.xlu1.b32.start [1/2] (short) (narrow) %v3057_v10, 8 }
 0x81e   : > { %3060 = vxpose.xlu1.b32.end [2/2] (short) (narrow) %v3059_v11, 8 }
 0x83c   : > { %1690 = vrot.lane.b32.xlu1 %v3384_v62, %s3649_s28 }
 0x840   : > { %1688 = vrot.lane.b32.xlu0 %v3391_v0, %s3649_s28  ;;  %v2083_v0 = vpack.c.bf16 %v2067_v13, %v2067_v13 }
 0x842   : > { %v2090_v23 = vsel %vm918_vm2, %v2083_v0, 0 }
 0x863   : > { %v1932_v12 = vpop.permute.xlu1 %1931  ;;  %v2085_v21 = vpop.permute.xlu0 %2084 }
 0x867   : > { %v2237_v22 = vpop.permute.xlu0 %2236 }
 0x88f   : > { %v2219_v24 = vpop.trf.xlu0 }
 0x890   : > { %v2235_v25 = vpack.c.bf16 %v2219_v24, %v2219_v24 }
 0x892   : > { %v2242_v26 = vsel %vm918_vm2, %v2235_v25, 0 }
 0x896   : > { %v3061_v15 = vpop.trf.xlu1 }
 0x897   : > { %v3065_v16 = vunpack.i.h.bf16 %v3061_v15  ;;  %v3062_v17 = vunpack.i.l.bf16 %v3061_v15 }
 0x899   : > { %v1780_v18 = vpack.c.bf16 %v3062_v17, %v3062_v17  ;;  %v1929_v20 = vpack.c.bf16 %v3065_v16, %v3065_v16 }
 0x89b   : > { %v1785_v19 = vsel %vm918_vm2, %v1780_v18, 0  ;;  %v1937_v62 = vsel %vm918_vm2, %v1929_v20, 0 }
 0x89c   : > { %2939 = vmatpush3.bf16.msra.mxu0 %v1785_v19 }
 0x89d   : > { %2950 = vmatprep.subr.bf16.mxu0 %v3126_v1 }
 0x89f   : > { %2941 = vmatmul.mubr.msk.bf16.vlgmr.msra.gmra.mxu0 %vm914_vm3, %v1747_v61 }
 0x8a0   : > { %2951 = vmatpush3.bf16.msra.mxu0 %v1937_v62  ;;  %2952 = vmatprep.mubr.msk.bf16.mxu0 %vm3127_vm0, %v3126_v1 }
 0x8a1   : > { %2962 = vmatprep.subr.bf16.mxu0 %v3126_v1 }
 0x8a7   : > { %2953 = vmatmul.mubr.msk.bf16.vlgmr.msra.gmra.mxu0 %vm914_vm3, %v1932_v12 }
 0x8a8   : > { %2963 = vmatpush3.bf16.msra.mxu0 %v2090_v23  ;;  %2964 = vmatprep.mubr.msk.bf16.mxu0 %vm3127_vm0, %v3126_v1 }
 0x8a9   : > { %2974 = vmatprep.subr.bf16.mxu0 %v3126_v1 }
 0x8ae   : > { %v1691_v27 = vpop.permute.xlu1 %1690 }
 0x8af   : > { %2965 = vmatmul.mubr.msk.bf16.vlgmr.msra.gmra.mxu0 %vm914_vm3, %v2085_v21  ;;  %2931 = vmatpush3.bf16.msra.mxu1 %v1691_v27 }
 0x8b0   : > { %2975 = vmatpush3.bf16.msra.mxu0 %v2242_v26  ;;  %2976 = vmatprep.mubr.msk.bf16.mxu0 %vm3127_vm0, %v3126_v1 }
 0x8b1   : > { %2932 = vmatprep.subr.bf16.mxu1 %v3126_v1  ;;  %2986 = vmatprep.subr.bf16.mxu0 %v3126_v1 }
 0x8b2   : > { %v1689_v28 = vpop.permute.xlu0 %1688 }
 0x8b3   : > { %2933 = vmatpush3.bf16.msra.mxu1 %v1689_v28 }
 0x8b4   : > { %2944 = vmatprep.subr.bf16.mxu1 %v3126_v1 }
 0x8b6   : > { %2935 = vmatmul.mubr.msk.bf16.vlgmr.msra.gmra.mxu1 %vm773_vm1, %v1687_v30 }
 0x8b7   : > { %2977 = vmatmul.mubr.msk.bf16.vlgmr.msra.gmra.mxu0 %vm914_vm3, %v2237_v22  ;;  %2946 = vmatprep.mubr.msk.bf16.mxu1 %vm3127_vm0, %v3126_v1 }
 0x8b8   : > { %2990 = vmatprep.mubr.msk.bf16.mxu0 %vm3127_vm0, %v3126_v1 }
 0x95f   : > { %v1821_v31 = vpop.f32.mrf.mxu0 }
 0x960   : > { %v1828_v32 = vsel %vm1827_vm7, %v1821_v31, -inf }
 0x961   : > { %1829 = vmax.xlane.f32.xlu1 %v1828_v32  ;;  %v2942_v33 = vpop.f32.mrf.mxu0 }
 0x963   : > { %v1824_v7 = vpop.f32.mrf.mxu0 }
 0x965   : > { %v2943_v14 = vpop.f32.mrf.mxu0 }
 0x967   : > { %v1973_v34 = vpop.f32.mrf.mxu0 }
 0x968   : > { %v1979_v35 = vsel %vm1827_vm7, %v1973_v34, -inf }
 0x969   : > { %1980 = vmax.xlane.f32.xlu0 %v1979_v35  ;;  %v2954_v3 = vpop.f32.mrf.mxu0 }
 0x96b   : > { %v1976_v36 = vpop.f32.mrf.mxu0 }
 0x96d   : > { %v2955_v37 = vpop.f32.mrf.mxu0 }
 0x96f   : > { %v2126_v38 = vpop.f32.mrf.mxu0 }
 0x970   : > { %v2132_v39 = vsel %vm1827_vm7, %v2126_v38, -inf }
 0x971   : > { %2133 = vmax.xlane.f32.xlu1 %v2132_v39  ;;  %v2966_v40 = vpop.f32.mrf.mxu0 }
 0x973   : > { %v2129_v41 = vpop.f32.mrf.mxu0 }
 0x975   : > { %v2967_v42 = vpop.f32.mrf.mxu0 }
 0x976   : > { %v1734_v48 = vpop.f32.mrf.mxu1 }
 0x977   : > { %v2278_v43 = vpop.f32.mrf.mxu0 }
 0x978   : > { %v2284_v44 = vsel %vm1827_vm7, %v2278_v43, -inf  ;;  %v2936_v49 = vpop.f32.mrf.mxu1 }
 0x979   : > { %2285 = vmax.xlane.f32.xlu1 %v2284_v44  ;;  %v2978_v45 = vpop.f32.mrf.mxu0  ;;  %v3072_v44 = vld [vmem:[%s3606_s10 + $0x8] sm:$0xff]  }
 0x97a   : > { %v1737_v50 = vpop.f32.mrf.mxu1  ;;  %2987 = vmatpush3.bf16.msra.mxu0 %v3072_v44 }
 0x97b   : > { %v2281_v46 = vpop.f32.mrf.mxu0  ;;  %2988 = vmatprep.subr.bf16.mxu0 %v3126_v1 }
 0x97c   : > { %v2937_v51 = vpop.f32.mrf.mxu1  ;;  %v3073_v46 = vld [vmem:[%s3606_s10] sm:$0xff]  }
 0x97d   : > { %v2979_v47 = vpop.f32.mrf.mxu0 }
 0x97e   : > { %2989 = vmatpush3.bf16.msra.mxu0 %v3073_v46 }
 0x97f   : > { %3002 = vmatprep.subr.bf16.mxu0 %v3126_v1 }
 0x98a   : > { %1694 = vrot.lane.b32.xlu1 %v3432_v29, %s3649_s28 }
 0x9ea   : > { %v1830_v52 = vpop.xlane.xlu1 %1829 }
 0x9eb   : > { %v1831_v54 = vsub.f32 %v1821_v31, %v1830_v52 }
 0x9ed   : > { %v1832_v55 = vmul.f32 1.442695, %v1831_v54 }
 0x9ef   : > { %3098 = vpow2.f32 %v1832_v55 }
 0x9f2   : > { %v1981_v56 = vpop.xlane.xlu0 %1980 }
 0x9f3   : > { %v1982_v57 = vsub.f32 %v1973_v34, %v1981_v56 }
 0x9f5   : > { %v1983_v58 = vmul.f32 1.442695, %v1982_v57 }
 0x9f7   : > { %3100 = vpow2.f32 %v1983_v58 }
 0x9fa   : > { %v2134_v59 = vpop.xlane.xlu1 %2133 }
 0x9fb   : > { %v2135_v60 = vsub.f32 %v2126_v38, %v2134_v59 }
 0x9fc   : > { %v3099_v61 = vpop.eup %3098 }
 0x9fd   : > { %v2136_v63 = vmul.f32 1.442695, %v2135_v60  ;;  %v1834_v4 = vsel %vm1827_vm7, %v3099_v61, 0.0 }
 0x9fe   : > { %1835 = vadd.xlane.f32.xlu0 %v1834_v4 }
 0x9ff   : > { %3102 = vpow2.f32 %v2136_v63 }
 0xa02   : > { %v2286_v29 = vpop.xlane.xlu1 %2285 }
 0xa03   : > { %v2287_v2 = vsub.f32 %v2278_v43, %v2286_v29 }
 0xa04   : > { %v3101_v5 = vpop.eup %3100 }
 0xa05   : > { %v2288_v6 = vmul.f32 1.442695, %v2287_v2  ;;  %v1985_v8 = vsel %vm1827_vm7, %v3101_v5, 0.0 }
 0xa06   : > { %1986 = vadd.xlane.f32.xlu0 %v1985_v8  ;;  %v1695_v9 = vpop.permute.xlu1 %1694 }
 0xa07   : > { %3104 = vpow2.f32 %v2288_v6  ;;  %v1735_v10 = vadd.f32 %v1734_v48, %v1695_v9  ;;  %v1738_v11 = vadd.f32 %v1737_v50, %v1695_v9 }
 0xa09   : > { %v1840_v12 = vpack.c.bf16 %v1738_v11, %v1735_v10 }
 0xa0b   : > { %1992 = vrot.lane.b32.xlu1 %v1840_v12, %s3646_s29  ;;  %v1846_v13 = vsel %vm1844_vm8, %v1840_v12, 0 }
 0xa0c   : > { %v3103_v15 = vpop.eup %3102  ;;  %2945 = vmatpush3.bf16.msra.mxu1 %v1846_v13 }
 0xa0d   : > { %v2138_v16 = vsel %vm1827_vm7, %v3103_v15, 0.0  ;;  %2956 = vmatprep.subr.bf16.mxu1 %v3126_v1 }
 0xa0e   : > { %2139 = vadd.xlane.f32.xlu0 %v2138_v16  ;;  %v3076_v16 = vld [vmem:[%s3610_s14 + $0x18] sm:$0xff]  }
 0xa0f   : > { %2296 = vrot.lane.b32.xlu1 %v1840_v12, %s3648_s24  ;;  %s3651_s24 = smov 16  }
 0xa14   : > { %v3105_v17 = vpop.eup %3104 }
 0xa15   : > { %v2290_v18 = vsel %vm1827_vm7, %v3105_v17, 0.0 }
 0xa16   : > { %2291 = vadd.xlane.f32.xlu0 %v2290_v18 }
 0xa2c   : > { %2144 = vrot.lane.b32.xlu0 %v1840_v12, %s3647_s30 }
 0xa7d   : > { %v1993_v0 = vpop.permute.xlu1 %1992 }
 0xa7e   : > { %v1998_v23 = vsel %vm1844_vm8, %v1993_v0, 0 }
 0xa81   : > { %v2297_v7 = vpop.permute.xlu1 %2296 }
 0xa82   : > { %v2302_v34 = vsel %vm1844_vm8, %v2297_v7, 0 }
 0xa87   : > { %v1836_v19 = vpop.xlane.xlu0 %1835 }
 0xa88   : > { %3106 = vrcp.f32 %v1836_v19 }
 0xa8f   : > { %v1987_v20 = vpop.xlane.xlu0 %1986 }
 0xa90   : > { %3108 = vrcp.f32 %v1987_v20 }
 0xa95   : > { %v3107_v21 = vpop.eup %3106 }
 0xa96   : > { %v1838_v62 = vmul.f32 %v3107_v21, %v3099_v61  ;;  %v2759_v61 = vld [vmem:[%s3607_s11] ss:$0 sm:$0xff] }
 0xa97   : > { %v2140_v22 = vpop.xlane.xlu0 %2139 }
 0xa98   : > { %3110 = vrcp.f32 %v2140_v22  ;;  %v1839_v24 = vpack.c.bf16 %v1838_v62, %v1838_v62  ;;  %v2763_v62 = vld [vmem:[%s3614_s18] ss:$0 sm:$0xff] }
 0xa99   : > { %v2764_v22 = vld [vmem:[%s3615_s19] ss:$0 sm:$0xff] }
 0xa9a   : > { %2947 = vmatmul.mubr.msk.bf16.vlgmr.msra.gmra.mxu1 %vm1827_vm7, %v1839_v24 }
 0xa9b   : > { %2957 = vmatpush3.bf16.msra.mxu1 %v1998_v23  ;;  %2958 = vmatprep.mubr.msk.bf16.mxu1 %vm3127_vm0, %v3126_v1 }
 0xa9c   : > { %2968 = vmatprep.subr.bf16.mxu1 %v3126_v1 }
 0xa9d   : > { %v3109_v25 = vpop.eup %3108 }
 0xa9e   : > { %v1989_v26 = vmul.f32 %v3109_v25, %v3101_v5 }
 0xa9f   : > { %v2292_v27 = vpop.xlane.xlu0 %2291 }
 0xaa0   : > { %3112 = vrcp.f32 %v2292_v27  ;;  %v1990_v28 = vpack.c.bf16 %v1989_v26, %v1989_v26  ;;  %v3078_v26 = vld [vmem:[%s3610_s14 + $0x8] sm:$0xff]   ;;  %v3079_v27 = vld [vmem:[%s3610_s14] sm:$0xff]  }
 0xaa2   : > { %2959 = vmatmul.mubr.msk.bf16.vlgmr.msra.gmra.mxu1 %vm1827_vm7, %v1990_v28  ;;  %v2765_v28 = vld [vmem:[%s3609_s13] ss:$0 sm:$0xff] }
 0xaa3   : > { %v2145_v30 = vpop.permute.xlu0 %2144  ;;  %2970 = vmatprep.mubr.msk.bf16.mxu1 %vm3127_vm0, %v3126_v1 }
 0xaa4   : > { %v2150_v31 = vsel %vm1844_vm8, %v2145_v30, 0 }
 0xaa5   : > { %v3111_v32 = vpop.eup %3110  ;;  %2969 = vmatpush3.bf16.msra.mxu1 %v2150_v31 }
 0xaa6   : > { %2980 = vmatprep.subr.bf16.mxu1 %v3126_v1  ;;  %v2142_v33 = vmul.f32 %v3111_v32, %v3103_v15  ;;  %v3074_v15 = vld [vmem:[%s3608_s12 + $0x8] sm:$0xff]  }
 0xaa8   : > { %v2143_v14 = vpack.c.bf16 %v2142_v33, %v2142_v33 }
 0xaaa   : > { %2971 = vmatmul.mubr.msk.bf16.vlgmr.msra.gmra.mxu1 %vm1827_vm7, %v2143_v14 }
 0xaab   : > { %2981 = vmatpush3.bf16.msra.mxu1 %v2302_v34  ;;  %2982 = vmatprep.mubr.msk.bf16.mxu1 %vm3127_vm0, %v3126_v1 }
 0xaac   : > { %2994 = vmatprep.subr.bf16.mxu1 %v3126_v1 }
 0xaad   : > { %v3113_v35 = vpop.eup %3112 }
 0xaae   : > { %v2294_v3 = vmul.f32 %v3113_v35, %v3105_v17  ;;  %v3077_v17 = vld [vmem:[%s3610_s14 + $0x10] sm:$0xff]  }
 0xab0   : > { %v2295_v36 = vpack.c.bf16 %v2294_v3, %v2294_v3 }
 0xab2   : > { %2983 = vmatmul.mubr.msk.bf16.vlgmr.msra.gmra.mxu1 %vm1827_vm7, %v2295_v36 }
 0xab3   : > { %2998 = vmatprep.mubr.msk.bf16.mxu1 %vm3127_vm0, %v3126_v1  ;;  %2995 = vmatpush3.bf16.msra.mxu1 %v3074_v15 }
 0xab4   : > { %2996 = vmatprep.subr.bf16.mxu1 %v3126_v1 }
 0xb5a   : > { %v1882_v37 = vpop.f32.mrf.mxu1 }
 0xb5b   : > { %1888 = vst.msk [vmem:[#allocation2] sm:$0xff] %vm914_vm3, %v1882_v37 }
 0xb5c   : > { %v2948_v38 = vpop.f32.mrf.mxu1 }
 0xb5e   : > { %v1885_v39 = vpop.f32.mrf.mxu1 }
 0xb60   : > { %v2949_v40 = vpop.f32.mrf.mxu1 }
 0xb62   : > { %v2034_v41 = vpop.f32.mrf.mxu1 }
 0xb63   : > { %2041 = vrot.lane.b32.xlu1 %v2034_v41, %s3650_s26 }
 0xb64   : > { %v2960_v42 = vpop.f32.mrf.mxu1 }
 0xb66   : > { %v2037_v43 = vpop.f32.mrf.mxu1 }
 0xb68   : > { %v2961_v45 = vpop.f32.mrf.mxu1 }
 0xb6a   : > { %v2186_v47 = vpop.f32.mrf.mxu1 }
 0xb6b   : > { %2193 = vrot.lane.b32.xlu1 %v2186_v47, %s3651_s24 }
 0xb6c   : > { %v2972_v48 = vpop.f32.mrf.mxu1 }
 0xb6e   : > { %v2189_v49 = vpop.f32.mrf.mxu1 }
 0xb70   : > { %v2973_v50 = vpop.f32.mrf.mxu1 }
 0xb71   : > { %v2775_v50 = vld [vmem:[%s3616_s20] ss:$0 sm:$0xff] }
 0xb72   : > { %v2338_v51 = vpop.f32.mrf.mxu1 }
 0xb73   : > { %2345 = vrot.lane.b32.xlu1 %v2338_v51, %s3652_s0 }
 0xb74   : > { %v2984_v52 = vpop.f32.mrf.mxu1 }
 0xb75   : > { %v2776_v52 = vld [vmem:[%s3617_s21] ss:$0 sm:$0xff] }
 0xb76   : > { %v2341_v54 = vpop.f32.mrf.mxu1 }
 0xb78   : > { %v2985_v55 = vpop.f32.mrf.mxu1 }
 0xbd5   : > { %v2042_v56 = vpop.permute.xlu1 %2041 }
 0xbd6   : > { %2044 = vst.msk [vmem:[#allocation2] sm:$0xff] %vm1172_vm4, %v2042_v56 }
 0xbdd   : > { %v2194_v57 = vpop.permute.xlu1 %2193 }
 0xbde   : > { %2196 = vst.msk [vmem:[#allocation2] sm:$0xff] %vm1322_vm5, %v2194_v57 }
 0xbe5   : > { %v2346_v58 = vpop.permute.xlu1 %2345 }
 0xbe6   : > { %2348 = vst.msk [vmem:[#allocation2] sm:$0xff] %vm1472_vm6, %v2346_v58 }
 0xbed   : > { %v2349_v59 = vld [vmem:[#allocation2] sm:$0xff] }
 0xbee   : > { %v2350_v60 = vpack.c.bf16 %v2349_v59, %v2349_v59 }
 0xbf0   : > { %2991 = vmatmul.mubr.msk.bf16.vlgmr.msra.gmra.mxu0 %vm773_vm1, %v2350_v60 }
 0xbf1   : > { %3010 = vmatprep.mubr.msk.bf16.mxu0 %vm3127_vm0, %v3126_v1  ;;  %3003 = vmatpush3.bf16.msra.mxu0 %v3076_v16 }
 0xbf2   : > { %3004 = vmatprep.subr.bf16.mxu0 %v3126_v1 }
 0xbf5   : > { %3005 = vmatpush3.bf16.msra.mxu0 %v3077_v17 }
 0xbf6   : > { %3006 = vmatprep.subr.bf16.mxu0 %v3126_v1 }
 0xbf9   : > { %3007 = vmatpush3.bf16.msra.mxu0 %v3078_v26 }
 0xbfa   : > { %3008 = vmatprep.subr.bf16.mxu0 %v3126_v1  ;;  %v2769_v1 = vld [vmem:[%s3611_s15] ss:$0 sm:$0xff] }
 0xbfd   : > { %3009 = vmatpush3.bf16.msra.mxu0 %v3079_v27 }
 0xcb0   : > { %v2406_v63 = vpop.f32.mrf.mxu0 }
 0xcb1   : > { %v2407_v4 = vadd.f32 %v2759_v61, %v2406_v63 }
 0xcb2   : > { %v2992_v29 = vpop.f32.mrf.mxu0 }
 0xcb3   : > { %v2412_v2 = vadd.f32 %v2407_v4, %v3446_v53  ;;  %v3075_v53 = vld [vmem:[%s3608_s12] sm:$0xff]  }
 0xcb4   : > { %v2409_v5 = vpop.f32.mrf.mxu0  ;;  %2997 = vmatpush3.bf16.msra.mxu1 %v3075_v53 }
 0xcb5   : > { %v2415_v6 = vsel %vm773_vm1, %v2412_v2, 0.0 }
 0xcb6   : > { %2416 = vadd.xlane.f32.xlu1 %v2415_v6  ;;  %v2993_v8 = vpop.f32.mrf.mxu0 }
 0xd3f   : > { %v2417_v9 = vpop.xlane.xlu1 %2416 }
 0xd40   : > { %v2418_v10 = vmul.f32 0.03125, %v2417_v9 }
 0xd42   : > { %v2419_v11 = vsub.f32 %v2412_v2, %v2418_v10 }
 0xd44   : > { %v2420_v12 = vmul.f32 %v2419_v11, %v2419_v11 }
 0xd46   : > { %v2421_v13 = vsel %vm773_vm1, %v2420_v12, 0.0 }
 0xd47   : > { %2422 = vadd.xlane.f32.xlu0 %v2421_v13 }
 0xdd0   : > { %v2423_v18 = vpop.xlane.xlu0 %2422 }
 0xdd1   : > { %v2424_v19 = vmul.f32 0.03125, %v2423_v18 }
 0xdd3   : > { %v2425_v20 = vadd.f32 1e-05, %v2424_v19 }
 0xdd5   : > { %3114 = vrsqrt.f32 %v2425_v20 }
 0xde2   : > { %v3115_v21 = vpop.eup %3114 }
 0xde3   : > { %v2427_v0 = vmul.f32 %v3115_v21, %v2419_v11 }
 0xde5   : > { %v2434_v23 = vmul.f32 %v2763_v62, %v2427_v0 }
 0xde7   : > { %v2441_v24 = vadd.f32 %v2764_v22, %v2434_v23 }
 0xde9   : > { %v2446_v25 = vpack.c.bf16 %v2441_v24, %v2441_v24 }
 0xdeb   : > { %2999 = vmatmul.mubr.msk.bf16.vlgmr.msra.gmra.mxu1 %vm773_vm1, %v2446_v25 }
 0xeab   : > { %v2503_v30 = vpop.f32.mrf.mxu1 }
 0xeac   : > { %v2504_v31 = vadd.f32 %v2765_v28, %v2503_v30 }
 0xead   : > { %v3000_v32 = vpop.f32.mrf.mxu1 }
 0xeae   : > { %v2509_v33 = vmax.f32 %v2504_v31, 0.0 }
 0xeaf   : > { %v2506_v7 = vpop.f32.mrf.mxu1 }
 0xeb0   : > { %v2518_v14 = vpack.c.bf16 %v2509_v33, %v2509_v33 }
 0xeb1   : > { %v3001_v34 = vpop.f32.mrf.mxu1 }
 0xeb2   : > { %3011 = vmatmul.mubr.msk.bf16.vlgmr.msra.gmra.mxu0 %vm2550_vm9, %v2518_v14 }
 0xf72   : > { %v2588_v35 = vpop.f32.mrf.mxu0 }
 0xf73   : > { %v2589_v3 = vadd.f32 %v2769_v1, %v2588_v35 }
 0xf74   : > { %v3012_v36 = vpop.f32.mrf.mxu0 }
 0xf75   : > { %v2594_v37 = vadd.f32 %v2589_v3, %v2441_v24 }
 0xf76   : > { %v2591_v38 = vpop.f32.mrf.mxu0 }
 0xf77   : > { %v2597_v39 = vsel %vm773_vm1, %v2594_v37, 0.0 }
 0xf78   : > { %2598 = vadd.xlane.f32.xlu0 %v2597_v39  ;;  %v3013_v40 = vpop.f32.mrf.mxu0 }
0x1001   : > { %v2599_v41 = vpop.xlane.xlu0 %2598 }
0x1002   : > { %v2600_v42 = vmul.f32 0.03125, %v2599_v41 }
0x1004   : > { %v2601_v43 = vsub.f32 %v2594_v37, %v2600_v42 }
0x1006   : > { %v2602_v44 = vmul.f32 %v2601_v43, %v2601_v43 }
0x1008   : > { %v2603_v45 = vsel %vm773_vm1, %v2602_v44, 0.0 }
0x1009   : > { %2604 = vadd.xlane.f32.xlu1 %v2603_v45 }
0x1092   : > { %v2605_v46 = vpop.xlane.xlu1 %2604 }
0x1093   : > { %v2606_v47 = vmul.f32 0.03125, %v2605_v46 }
0x1095   : > { %v2607_v48 = vadd.f32 1e-05, %v2606_v47 }
0x1097   : > { %3116 = vrsqrt.f32 %v2607_v48 }
0x10a4   : > { %v3117_v49 = vpop.eup %3116 }
0x10a5   : > { %v2609_v51 = vmul.f32 %v3117_v49, %v2601_v43 }
0x10a7   : > { %v2616_v54 = vmul.f32 %v2775_v50, %v2609_v51 }
0x10a9   : > { %v2623_v55 = vadd.f32 %v2776_v52, %v2616_v54 }
0x10ab   : > { %2624 = vst.msk [vmem:[%s735_s27] sm:$0xff] %vm773_vm1, %v2623_v55 }
0x10ac PF: > { %s32_s3 = sadd.s32 1, %s3124_s3  }
0x10ad   : > { %p29_p4 = scmp.ge.s32.totalorder %s32_s3, 4  }
0x10af   :  { %31 = sbr.rel (!%p29_p4) target bundleno = 8 (0x8), region = 147 }

</bundles_post_ra>
